<compile_context>
chip_gen: v6e
topology: v6e:2x2x1
jax: 0.10.0
libtpu: 0.0.40
codegen_flags: <defaults>
</compile_context>

<pallas_src>
import functools

import jax
import jax.numpy as jnp
from jax.experimental import pallas as pl
from jax.experimental.pallas import tpu as pltpu

EPS = 1e-5          # nn.LayerNorm default
LANE = 128


def _round_up(n, m):
    return ((n + m - 1) // m) * m


def _layer_norm(h, gamma, beta):
    mu = jnp.mean(h, axis=-1, keepdims=True)
    var = jnp.mean(jnp.square(h - mu), axis=-1, keepdims=True)
    return (h - mu) * jax.lax.rsqrt(var + EPS) * gamma + beta


def _gelu(x):
    # tanh-approximate GELU (EUP-friendly).
    # TODO(synk): PyTorch nn.GELU() default is the exact erf-based GELU.
    c = 0.7978845608028654  # sqrt(2/pi)
    return 0.5 * x * (1.0 + jnp.tanh(c * (x + 0.044715 * x * x * x)))


def _attention_regressor_kernel(num_layers,
                                x_ref,
                                wi_ref, bi_ref,
                                wv_ref, bv_ref,
                                wao_ref, bao_ref,
                                lng_ref, lnb_ref,
                                w1_ref, b1_ref,
                                w2_ref, b2_ref,
                                hg_ref, hb_ref,
                                wh_ref, bh_ref,
                                wo_ref,
                                bo_ref,          # (1,1) scalar bias in SMEM
                                out_ref):
    f32, bf16 = jnp.float32, jnp.bfloat16

    # input projection (bf16 operands, f32 accumulation)
    h = (jnp.dot(x_ref[...].astype(bf16), wi_ref[...],
                 preferred_element_type=f32) + bi_ref[...])

    for l in range(num_layers):          # static unroll; num_layers is small
        g = lng_ref[l]                   # (1, H) — shared LN params
        b = lnb_ref[l]

        # --- self-attention with seq_len == 1: softmax over a single key is 1,
        #     so MHA(h, h, h) == out_proj(v_proj(h)); attn dropout = identity.
        v = (jnp.dot(h.astype(bf16), wv_ref[l],
                     preferred_element_type=f32) + bv_ref[l])
        a = (jnp.dot(v.astype(bf16), wao_ref[l],
                     preferred_element_type=f32) + bao_ref[l])
        h = _layer_norm(h + a, g, b)

        # --- FFN: Linear(H,4H) -> GELU -> Linear(4H,H); dropout = identity.
        f = (jnp.dot(h.astype(bf16), w1_ref[l],
                     preferred_element_type=f32) + b1_ref[l])
        # GELU on the wide (tile_m, 4H) intermediate in bf16: halves vreg
        # pressure and VALU/EUP work, and feeds the bf16 w2 matmul directly.
        # TODO(synk): keep f32 here on v5e (no bf16 VPU/EUP path).
        f = _gelu(f.astype(bf16))
        f = (jnp.dot(f, w2_ref[l],
                     preferred_element_type=f32) + b2_ref[l])
        h = _layer_norm(h + f, g, b)     # same LayerNorm module applied again

    # --- output head: LN -> Linear(H, H2) -> GELU -> Linear(H2, 1)
    # wh/bh/wo are zero-padded to a full 128-lane width, so the padded lanes
    # contribute GELU(0) * 0 == 0 and everything runs on full vregs.
    y = _layer_norm(h, hg_ref[...], hb_ref[...])
    y = _gelu(jnp.dot(y.astype(bf16), wh_ref[...],
                      preferred_element_type=f32) + bh_ref[...])
    # N=1 matmul replaced by VPU multiply + lane reduction (XLU).
    z = jnp.sum(y * wo_ref[...], axis=-1, keepdims=True) + bo_ref[0, 0]
    out_ref[...] = z.astype(out_ref.dtype)       # (tile_m, 1) — no 128x slab


def attention_regressor(x, packed, *, tile_m=256):
    """x: (B, input_dim) -> (B, 1) float32.  `packed` from pack_params()."""
    B, D_in = x.shape
    L = int(packed["wv"].shape[0])

    # 256-row tiles fill the v6e/v7x 256-wide MXU and amortize per-step
    # overhead; clamp to the 8-rounded batch so tiny batches don't over-pad.
    tile_m = min(tile_m, _round_up(B, 8))
    assert tile_m % 8 == 0

    B_pad = pl.cdiv(B, tile_m) * tile_m
    if B_pad != B:
        x = jnp.pad(x, ((0, B_pad - B), (0, 0)))

    weights = [
        packed["wi"], packed["bi"],
        packed["wv"], packed["bv"],
        packed["wao"], packed["bao"],
        packed["lng"], packed["lnb"],
        packed["w1"], packed["b1"],
        packed["w2"], packed["b2"],
        packed["hg"], packed["hb"],
        packed["wh"], packed["bh"],
        packed["wo"],                      # used on the VPU, stays f32
    ]

    # Grid-invariant weights: single-buffered (their block index never
    # changes across the batch grid axis).
    def const(a):
        return pl.BlockSpec(a.shape, lambda i, n=a.ndim: (0,) * n,
                            pipeline_mode=pl.Buffered(1))

    # Explicit VMEM budget: single-buffered weights + double-buffered x / out
    # tiles + generous headroom for f32 intermediates and internal scratch.
    H = packed["wi"].shape[1]
    F = packed["w1"].shape[2]
    nbytes = lambda a: int(a.size) * jnp.dtype(a.dtype).itemsize
    weight_bytes = sum(nbytes(w) for w in weights)
    stream_bytes = 2 * (tile_m * D_in * jnp.dtype(x.dtype).itemsize + tile_m * 4)
    interm_bytes = 6 * tile_m * max(F, H, LANE) * 4
    vmem_limit = int(1.25 * (weight_bytes + stream_bytes + interm_bytes)) + (8 << 20)
    vmem_limit = min(max(vmem_limit, 32 << 20), 64 << 20)

    kernel = functools.partial(_attention_regressor_kernel, L)

    out = pl.pallas_call(
        kernel,
        out_shape=jax.ShapeDtypeStruct((B_pad, 1), jnp.float32),
        grid_spec=pltpu.PrefetchScalarGridSpec(
            num_scalar_prefetch=0,
            grid=(B_pad // tile_m,),
            in_specs=[pl.BlockSpec((tile_m, D_in), lambda i: (i, 0))]
                     + [const(w) for w in weights]
                     + [pl.BlockSpec(memory_space=pltpu.MemorySpace.SMEM)],
            out_specs=pl.BlockSpec((tile_m, 1), lambda i: (i, 0)),
        ),
        compiler_params=pltpu.CompilerParams(
            dimension_semantics=("parallel",),
            vmem_limit_bytes=vmem_limit),
    )(x, *weights, packed["bo"])

    return out[:B]


def pack_params(params):
    """One-time packing (do this once, alongside the weights — NOT per call):
    pre-cast matmul weights to bf16 and zero-pad the output head to a full
    128-lane width."""
    bf = lambda a: a.astype(jnp.bfloat16)
    H2 = params["wh"].shape[1]
    H2_pad = max(LANE, _round_up(H2, LANE))
    pad = (lambda a: jnp.pad(a, ((0, 0), (0, H2_pad - H2)))) if H2_pad != H2 \
        else (lambda a: a)
    return {
        "wi": bf(params["wi"]), "bi": params["bi"],
        "wv": bf(params["wv"]), "bv": params["bv"],
        "wao": bf(params["wao"]), "bao": params["bao"],
        "lng": params["lng"], "lnb": params["lnb"],
        "w1": bf(params["w1"]), "b1": params["b1"],
        "w2": bf(params["w2"]), "b2": params["b2"],
        "hg": params["hg"], "hb": params["hb"],
        "wh": bf(pad(params["wh"])), "bh": pad(params["bh"]),
        "wo": pad(params["wo"]),           # VPU operand, stays f32
        "bo": params["bo"],
    }


def init_params(key, input_dim, hidden_dim, num_layers):
    """Xavier-uniform weights, zero biases (matches _init_weights).
    Linear weights stored as (in_features, out_features)."""
    H, H2, F = hidden_dim, hidden_dim // 2, hidden_dim * 4
    L = num_layers

    def xavier(k, shape):
        fan_in, fan_out = shape[-2], shape[-1]
        bound = (6.0 / (fan_in + fan_out)) ** 0.5
        return jax.random.uniform(k, shape, jnp.float32, -bound, bound)

    ks = iter(jax.random.split(key, 8 + 4 * L))
    return {
        "wi": xavier(next(ks), (input_dim, H)),
        "bi": jnp.zeros((1, H), jnp.float32),
        # attention: with seq_len == 1 only the v / out projections matter.
        "wv": jnp.stack([xavier(next(ks), (H, H)) for _ in range(L)]),
        "bv": jnp.zeros((L, 1, H), jnp.float32),
        "wao": jnp.stack([xavier(next(ks), (H, H)) for _ in range(L)]),
        "bao": jnp.zeros((L, 1, H), jnp.float32),
        # per-layer LayerNorm (shared between the post-attn and post-FFN uses)
        "lng": jnp.ones((L, 1, H), jnp.float32),
        "lnb": jnp.zeros((L, 1, H), jnp.float32),
        # FFN
        "w1": jnp.stack([xavier(next(ks), (H, F)) for _ in range(L)]),
        "b1": jnp.zeros((L, 1, F), jnp.float32),
        "w2": jnp.stack([xavier(next(ks), (F, H)) for _ in range(L)]),
        "b2": jnp.zeros((L, 1, H), jnp.float32),
        # output head
        "hg": jnp.ones((1, H), jnp.float32),
        "hb": jnp.zeros((1, H), jnp.float32),
        "wh": xavier(next(ks), (H, H2)),
        "bh": jnp.zeros((1, H2), jnp.float32),
        "wo": xavier(next(ks), (1, H2)),   # Linear(H2, 1) weight as a lane row
        "bo": jnp.zeros((1, 1), jnp.float32),
    }


def reference_forward(x, params, matmul_dtype=jnp.float32,
                      ffn_gelu_dtype=jnp.float32):
    """Plain-JAX reference (same seq_len==1 attention simplification).
    matmul_dtype / ffn_gelu_dtype let us mirror the kernel's bf16 policy."""
    md = matmul_dtype
    dot = lambda a, w: jnp.dot(a.astype(md), w.astype(md),
                               preferred_element_type=jnp.float32)
    h = dot(x, params["wi"]) + params["bi"]
    L = params["wv"].shape[0]
    for l in range(L):
        g, b = params["lng"][l], params["lnb"][l]
        v = dot(h, params["wv"][l]) + params["bv"][l]
        a = dot(v, params["wao"][l]) + params["bao"][l]
        h = _layer_norm(h + a, g, b)
        f = dot(h, params["w1"][l]) + params["b1"][l]
        f = _gelu(f.astype(ffn_gelu_dtype)).astype(jnp.float32)
        f = dot(f, params["w2"][l]) + params["b2"][l]
        h = _layer_norm(h + f, g, b)
    y = _layer_norm(h, params["hg"], params["hb"])
    y = _gelu(dot(y, params["wh"]) + params["bh"])
    return jnp.sum(y * params["wo"], axis=-1, keepdims=True) + params["bo"]


if __name__ == "__main__":
    key = jax.random.PRNGKey(0)
    k_x, k_p = jax.random.split(key)

    # small demo shapes (num_heads only affects head splitting, which is a
    # no-op for seq_len == 1)
    batch, input_dim, hidden_dim, num_layers = 16, 64, 128, 2
    x = jax.random.normal(k_x, (batch, input_dim), jnp.float32)
    params = init_params(k_p, input_dim, hidden_dim, num_layers)
    packed = pack_params(params)   # one-time weight packing (bf16 + head pad)

    out = jax.block_until_ready(attention_regressor(x, packed))
    assert out.shape == (batch, 1)

    # tight check against a reference using the same bf16 matmul / bf16 FFN
    # GELU / f32 accumulation policy as the kernel
    ref_bf16 = reference_forward(x, params, jnp.bfloat16, jnp.bfloat16)
    assert jnp.allclose(out, ref_bf16, atol=5e-3, rtol=5e-3), "mismatch vs bf16 reference"

    # loose check against the full-f32 reference
    ref_f32 = reference_forward(x, params, jnp.float32, jnp.float32)
    assert jnp.allclose(out, ref_f32, atol=1e-1, rtol=1e-1), "mismatch vs f32 reference"

    print("KERNEL_OK")
</pallas_src>

<mosaic_0001>
module attributes {stable_mosaic.version = 11 : i64} {
  func.func @_attention_regressor_kernel(%arg0: i32, %arg1: memref<16x64xf32, #tpu.memory_space<vmem>>, %arg2: memref<64x128xbf16, #tpu.memory_space<vmem>>, %arg3: memref<1x128xf32, #tpu.memory_space<vmem>>, %arg4: memref<2x128x128xbf16, #tpu.memory_space<vmem>>, %arg5: memref<2x1x128xf32, #tpu.memory_space<vmem>>, %arg6: memref<2x128x128xbf16, #tpu.memory_space<vmem>>, %arg7: memref<2x1x128xf32, #tpu.memory_space<vmem>>, %arg8: memref<2x1x128xf32, #tpu.memory_space<vmem>>, %arg9: memref<2x1x128xf32, #tpu.memory_space<vmem>>, %arg10: memref<2x128x512xbf16, #tpu.memory_space<vmem>>, %arg11: memref<2x1x512xf32, #tpu.memory_space<vmem>>, %arg12: memref<2x512x128xbf16, #tpu.memory_space<vmem>>, %arg13: memref<2x1x128xf32, #tpu.memory_space<vmem>>, %arg14: memref<1x128xf32, #tpu.memory_space<vmem>>, %arg15: memref<1x128xf32, #tpu.memory_space<vmem>>, %arg16: memref<128x128xbf16, #tpu.memory_space<vmem>>, %arg17: memref<1x128xf32, #tpu.memory_space<vmem>>, %arg18: memref<1x128xf32, #tpu.memory_space<vmem>>, %arg19: memref<1x1xf32, #tpu.memory_space<smem>>, %arg20: memref<16x1xf32, #tpu.memory_space<vmem>>) attributes {dimension_semantics = [#tpu.dimension_semantics<parallel>], iteration_bounds = array<i64: 1>, scalar_prefetch = 0 : i64, scratch_operands = 0 : i64, tpu.core_type = #tpu.core_type<tc>, window_params = [{transform_indices = @transform_0, window_bounds = array<i64: 16, 64>}, {pipeline_mode = #tpu.pipeline_mode<synchronous>, transform_indices = @transform_1, window_bounds = array<i64: 64, 128>}, {pipeline_mode = #tpu.pipeline_mode<synchronous>, transform_indices = @transform_2, window_bounds = array<i64: 1, 128>}, {pipeline_mode = #tpu.pipeline_mode<synchronous>, transform_indices = @transform_3, window_bounds = array<i64: 2, 128, 128>}, {pipeline_mode = #tpu.pipeline_mode<synchronous>, transform_indices = @transform_4, window_bounds = array<i64: 2, 1, 128>}, {pipeline_mode = #tpu.pipeline_mode<synchronous>, transform_indices = @transform_5, window_bounds = array<i64: 2, 128, 128>}, {pipeline_mode = #tpu.pipeline_mode<synchronous>, transform_indices = @transform_6, window_bounds = array<i64: 2, 1, 128>}, {pipeline_mode = #tpu.pipeline_mode<synchronous>, transform_indices = @transform_7, window_bounds = array<i64: 2, 1, 128>}, {pipeline_mode = #tpu.pipeline_mode<synchronous>, transform_indices = @transform_8, window_bounds = array<i64: 2, 1, 128>}, {pipeline_mode = #tpu.pipeline_mode<synchronous>, transform_indices = @transform_9, window_bounds = array<i64: 2, 128, 512>}, {pipeline_mode = #tpu.pipeline_mode<synchronous>, transform_indices = @transform_10, window_bounds = array<i64: 2, 1, 512>}, {pipeline_mode = #tpu.pipeline_mode<synchronous>, transform_indices = @transform_11, window_bounds = array<i64: 2, 512, 128>}, {pipeline_mode = #tpu.pipeline_mode<synchronous>, transform_indices = @transform_12, window_bounds = array<i64: 2, 1, 128>}, {pipeline_mode = #tpu.pipeline_mode<synchronous>, transform_indices = @transform_13, window_bounds = array<i64: 1, 128>}, {pipeline_mode = #tpu.pipeline_mode<synchronous>, transform_indices = @transform_14, window_bounds = array<i64: 1, 128>}, {pipeline_mode = #tpu.pipeline_mode<synchronous>, transform_indices = @transform_15, window_bounds = array<i64: 128, 128>}, {pipeline_mode = #tpu.pipeline_mode<synchronous>, transform_indices = @transform_16, window_bounds = array<i64: 1, 128>}, {pipeline_mode = #tpu.pipeline_mode<synchronous>, transform_indices = @transform_17, window_bounds = array<i64: 1, 128>}, {transform_indices = @transform_18, window_bounds = array<i64: 1, 1>}, {transform_indices = @transform_19, window_bounds = array<i64: 16, 1>}]} {
    %c0 = arith.constant 0 : index
    %c0_0 = arith.constant 0 : index
    %0 = vector.load %arg1[%c0, %c0_0] : memref<16x64xf32, #tpu.memory_space<vmem>>, vector<16x64xf32>
    %1 = arith.truncf %0 : vector<16x64xf32> to vector<16x64xbf16>
    %c0_1 = arith.constant 0 : index
    %c0_2 = arith.constant 0 : index
    %2 = vector.load %arg2[%c0_1, %c0_2] : memref<64x128xbf16, #tpu.memory_space<vmem>>, vector<64x128xbf16>
    %cst = arith.constant dense<0.000000e+00> : vector<16x128xf32>
    %3 = tpu.matmul %1, %2, %cst {dimension_numbers = #tpu.dot_dimension_numbers<[1], [0], [0], [1], [0, 0, 1, 1], [], []>} : vector<16x64xbf16>, vector<64x128xbf16>, vector<16x128xf32> -> vector<16x128xf32>
    %c0_3 = arith.constant 0 : index
    %c0_4 = arith.constant 0 : index
    %4 = vector.load %arg3[%c0_3, %c0_4] : memref<1x128xf32, #tpu.memory_space<vmem>>, vector<1x128xf32>
    %5 = vector.broadcast %4 : vector<1x128xf32> to vector<16x128xf32>
    %6 = arith.addf %3, %5 : vector<16x128xf32>
    %c0_5 = arith.constant 0 : index
    %c0_6 = arith.constant 0 : index
    %c0_7 = arith.constant 0 : index
    %7 = vector.load %arg8[%c0_5, %c0_6, %c0_7] : memref<2x1x128xf32, #tpu.memory_space<vmem>>, vector<1x1x128xf32>
    %8 = vector.shape_cast %7 : vector<1x1x128xf32> to vector<1x128xf32>
    %c0_8 = arith.constant 0 : index
    %c0_9 = arith.constant 0 : index
    %c0_10 = arith.constant 0 : index
    %9 = vector.load %arg9[%c0_8, %c0_9, %c0_10] : memref<2x1x128xf32, #tpu.memory_space<vmem>>, vector<1x1x128xf32>
    %10 = vector.shape_cast %9 : vector<1x1x128xf32> to vector<1x128xf32>
    %11 = arith.truncf %6 : vector<16x128xf32> to vector<16x128xbf16>
    %c0_11 = arith.constant 0 : index
    %c0_12 = arith.constant 0 : index
    %c0_13 = arith.constant 0 : index
    %12 = vector.load %arg4[%c0_11, %c0_12, %c0_13] : memref<2x128x128xbf16, #tpu.memory_space<vmem>>, vector<1x128x128xbf16>
    %13 = vector.shape_cast %12 : vector<1x128x128xbf16> to vector<128x128xbf16>
    %cst_14 = arith.constant dense<0.000000e+00> : vector<16x128xf32>
    %14 = tpu.matmul %11, %13, %cst_14 {dimension_numbers = #tpu.dot_dimension_numbers<[1], [0], [0], [1], [0, 0, 1, 1], [], []>} : vector<16x128xbf16>, vector<128x128xbf16>, vector<16x128xf32> -> vector<16x128xf32>
    %c0_15 = arith.constant 0 : index
    %c0_16 = arith.constant 0 : index
    %c0_17 = arith.constant 0 : index
    %15 = vector.load %arg5[%c0_15, %c0_16, %c0_17] : memref<2x1x128xf32, #tpu.memory_space<vmem>>, vector<1x1x128xf32>
    %16 = vector.shape_cast %15 : vector<1x1x128xf32> to vector<1x128xf32>
    %17 = vector.broadcast %16 : vector<1x128xf32> to vector<16x128xf32>
    %18 = arith.addf %14, %17 : vector<16x128xf32>
    %19 = arith.truncf %18 : vector<16x128xf32> to vector<16x128xbf16>
    %c0_18 = arith.constant 0 : index
    %c0_19 = arith.constant 0 : index
    %c0_20 = arith.constant 0 : index
    %20 = vector.load %arg6[%c0_18, %c0_19, %c0_20] : memref<2x128x128xbf16, #tpu.memory_space<vmem>>, vector<1x128x128xbf16>
    %21 = vector.shape_cast %20 : vector<1x128x128xbf16> to vector<128x128xbf16>
    %cst_21 = arith.constant dense<0.000000e+00> : vector<16x128xf32>
    %22 = tpu.matmul %19, %21, %cst_21 {dimension_numbers = #tpu.dot_dimension_numbers<[1], [0], [0], [1], [0, 0, 1, 1], [], []>} : vector<16x128xbf16>, vector<128x128xbf16>, vector<16x128xf32> -> vector<16x128xf32>
    %c0_22 = arith.constant 0 : index
    %c0_23 = arith.constant 0 : index
    %c0_24 = arith.constant 0 : index
    %23 = vector.load %arg7[%c0_22, %c0_23, %c0_24] : memref<2x1x128xf32, #tpu.memory_space<vmem>>, vector<1x1x128xf32>
    %24 = vector.shape_cast %23 : vector<1x1x128xf32> to vector<1x128xf32>
    %25 = vector.broadcast %24 : vector<1x128xf32> to vector<16x128xf32>
    %26 = arith.addf %22, %25 : vector<16x128xf32>
    %27 = arith.addf %6, %26 : vector<16x128xf32>
    %cst_25 = arith.constant dense<0.000000e+00> : vector<16xf32>
    %28 = vector.multi_reduction <add>, %27, %cst_25 [1] : vector<16x128xf32> to vector<16xf32>
    %29 = vector.shape_cast %28 : vector<16xf32> to vector<16x1xf32>
    %cst_26 = arith.constant 1.280000e+02 : f32
    %30 = vector.broadcast %cst_26 : f32 to vector<16x1xf32>
    %31 = arith.divf %29, %30 : vector<16x1xf32>
    %32 = vector.broadcast %31 : vector<16x1xf32> to vector<16x128xf32>
    %33 = arith.subf %27, %32 : vector<16x128xf32>
    %34 = arith.mulf %33, %33 : vector<16x128xf32>
    %cst_27 = arith.constant dense<0.000000e+00> : vector<16xf32>
    %35 = vector.multi_reduction <add>, %34, %cst_27 [1] : vector<16x128xf32> to vector<16xf32>
    %36 = vector.shape_cast %35 : vector<16xf32> to vector<16x1xf32>
    %cst_28 = arith.constant 1.280000e+02 : f32
    %37 = vector.broadcast %cst_28 : f32 to vector<16x1xf32>
    %38 = arith.divf %36, %37 : vector<16x1xf32>
    %39 = vector.broadcast %31 : vector<16x1xf32> to vector<16x128xf32>
    %40 = arith.subf %27, %39 : vector<16x128xf32>
    %cst_29 = arith.constant 9.99999974E-6 : f32
    %41 = vector.broadcast %cst_29 : f32 to vector<16x1xf32>
    %42 = arith.addf %38, %41 : vector<16x1xf32>
    %43 = math.rsqrt %42 : vector<16x1xf32>
    %44 = vector.broadcast %43 : vector<16x1xf32> to vector<16x128xf32>
    %45 = arith.mulf %40, %44 : vector<16x128xf32>
    %46 = vector.broadcast %8 : vector<1x128xf32> to vector<16x128xf32>
    %47 = arith.mulf %45, %46 : vector<16x128xf32>
    %48 = vector.broadcast %10 : vector<1x128xf32> to vector<16x128xf32>
    %49 = arith.addf %47, %48 : vector<16x128xf32>
    %50 = arith.truncf %49 : vector<16x128xf32> to vector<16x128xbf16>
    %c0_30 = arith.constant 0 : index
    %c0_31 = arith.constant 0 : index
    %c0_32 = arith.constant 0 : index
    %51 = vector.load %arg10[%c0_30, %c0_31, %c0_32] : memref<2x128x512xbf16, #tpu.memory_space<vmem>>, vector<1x128x512xbf16>
    %52 = vector.shape_cast %51 : vector<1x128x512xbf16> to vector<128x512xbf16>
    %cst_33 = arith.constant dense<0.000000e+00> : vector<16x512xf32>
    %53 = tpu.matmul %50, %52, %cst_33 {dimension_numbers = #tpu.dot_dimension_numbers<[1], [0], [0], [1], [0, 0, 1, 1], [], []>} : vector<16x128xbf16>, vector<128x512xbf16>, vector<16x512xf32> -> vector<16x512xf32>
    %c0_34 = arith.constant 0 : index
    %c0_35 = arith.constant 0 : index
    %c0_36 = arith.constant 0 : index
    %54 = vector.load %arg11[%c0_34, %c0_35, %c0_36] : memref<2x1x512xf32, #tpu.memory_space<vmem>>, vector<1x1x512xf32>
    %55 = vector.shape_cast %54 : vector<1x1x512xf32> to vector<1x512xf32>
    %56 = vector.broadcast %55 : vector<1x512xf32> to vector<16x512xf32>
    %57 = arith.addf %53, %56 : vector<16x512xf32>
    %58 = arith.truncf %57 : vector<16x512xf32> to vector<16x512xbf16>
    %cst_37 = arith.constant 5.000000e-01 : bf16
    %59 = vector.broadcast %cst_37 : bf16 to vector<16x512xbf16>
    %60 = arith.mulf %59, %58 : vector<16x512xbf16>
    %cst_38 = arith.constant 4.467770e-02 : bf16
    %61 = vector.broadcast %cst_38 : bf16 to vector<16x512xbf16>
    %62 = arith.mulf %61, %58 : vector<16x512xbf16>
    %63 = arith.mulf %62, %58 : vector<16x512xbf16>
    %64 = arith.mulf %63, %58 : vector<16x512xbf16>
    %65 = arith.addf %58, %64 : vector<16x512xbf16>
    %cst_39 = arith.constant 7.968750e-01 : bf16
    %66 = vector.broadcast %cst_39 : bf16 to vector<16x512xbf16>
    %67 = arith.mulf %66, %65 : vector<16x512xbf16>
    %68 = math.tanh %67 : vector<16x512xbf16>
    %cst_40 = arith.constant 1.000000e+00 : bf16
    %69 = vector.broadcast %cst_40 : bf16 to vector<16x512xbf16>
    %70 = arith.addf %69, %68 : vector<16x512xbf16>
    %71 = arith.mulf %60, %70 : vector<16x512xbf16>
    %c0_41 = arith.constant 0 : index
    %c0_42 = arith.constant 0 : index
    %c0_43 = arith.constant 0 : index
    %72 = vector.load %arg12[%c0_41, %c0_42, %c0_43] : memref<2x512x128xbf16, #tpu.memory_space<vmem>>, vector<1x512x128xbf16>
    %73 = vector.shape_cast %72 : vector<1x512x128xbf16> to vector<512x128xbf16>
    %cst_44 = arith.constant dense<0.000000e+00> : vector<16x128xf32>
    %74 = tpu.matmul %71, %73, %cst_44 {dimension_numbers = #tpu.dot_dimension_numbers<[1], [0], [0], [1], [0, 0, 1, 1], [], []>} : vector<16x512xbf16>, vector<512x128xbf16>, vector<16x128xf32> -> vector<16x128xf32>
    %c0_45 = arith.constant 0 : index
    %c0_46 = arith.constant 0 : index
    %c0_47 = arith.constant 0 : index
    %75 = vector.load %arg13[%c0_45, %c0_46, %c0_47] : memref<2x1x128xf32, #tpu.memory_space<vmem>>, vector<1x1x128xf32>
    %76 = vector.shape_cast %75 : vector<1x1x128xf32> to vector<1x128xf32>
    %77 = vector.broadcast %76 : vector<1x128xf32> to vector<16x128xf32>
    %78 = arith.addf %74, %77 : vector<16x128xf32>
    %79 = arith.addf %49, %78 : vector<16x128xf32>
    %cst_48 = arith.constant dense<0.000000e+00> : vector<16xf32>
    %80 = vector.multi_reduction <add>, %79, %cst_48 [1] : vector<16x128xf32> to vector<16xf32>
    %81 = vector.shape_cast %80 : vector<16xf32> to vector<16x1xf32>
    %cst_49 = arith.constant 1.280000e+02 : f32
    %82 = vector.broadcast %cst_49 : f32 to vector<16x1xf32>
    %83 = arith.divf %81, %82 : vector<16x1xf32>
    %84 = vector.broadcast %83 : vector<16x1xf32> to vector<16x128xf32>
    %85 = arith.subf %79, %84 : vector<16x128xf32>
    %86 = arith.mulf %85, %85 : vector<16x128xf32>
    %cst_50 = arith.constant dense<0.000000e+00> : vector<16xf32>
    %87 = vector.multi_reduction <add>, %86, %cst_50 [1] : vector<16x128xf32> to vector<16xf32>
    %88 = vector.shape_cast %87 : vector<16xf32> to vector<16x1xf32>
    %cst_51 = arith.constant 1.280000e+02 : f32
    %89 = vector.broadcast %cst_51 : f32 to vector<16x1xf32>
    %90 = arith.divf %88, %89 : vector<16x1xf32>
    %91 = vector.broadcast %83 : vector<16x1xf32> to vector<16x128xf32>
    %92 = arith.subf %79, %91 : vector<16x128xf32>
    %cst_52 = arith.constant 9.99999974E-6 : f32
    %93 = vector.broadcast %cst_52 : f32 to vector<16x1xf32>
    %94 = arith.addf %90, %93 : vector<16x1xf32>
    %95 = math.rsqrt %94 : vector<16x1xf32>
    %96 = vector.broadcast %95 : vector<16x1xf32> to vector<16x128xf32>
    %97 = arith.mulf %92, %96 : vector<16x128xf32>
    %98 = vector.broadcast %8 : vector<1x128xf32> to vector<16x128xf32>
    %99 = arith.mulf %97, %98 : vector<16x128xf32>
    %100 = vector.broadcast %10 : vector<1x128xf32> to vector<16x128xf32>
    %101 = arith.addf %99, %100 : vector<16x128xf32>
    %c1 = arith.constant 1 : index
    %c0_53 = arith.constant 0 : index
    %c0_54 = arith.constant 0 : index
    %102 = vector.load %arg8[%c1, %c0_53, %c0_54] : memref<2x1x128xf32, #tpu.memory_space<vmem>>, vector<1x1x128xf32>
    %103 = vector.shape_cast %102 : vector<1x1x128xf32> to vector<1x128xf32>
    %c1_55 = arith.constant 1 : index
    %c0_56 = arith.constant 0 : index
    %c0_57 = arith.constant 0 : index
    %104 = vector.load %arg9[%c1_55, %c0_56, %c0_57] : memref<2x1x128xf32, #tpu.memory_space<vmem>>, vector<1x1x128xf32>
    %105 = vector.shape_cast %104 : vector<1x1x128xf32> to vector<1x128xf32>
    %106 = arith.truncf %101 : vector<16x128xf32> to vector<16x128xbf16>
    %c1_58 = arith.constant 1 : index
    %c0_59 = arith.constant 0 : index
    %c0_60 = arith.constant 0 : index
    %107 = vector.load %arg4[%c1_58, %c0_59, %c0_60] : memref<2x128x128xbf16, #tpu.memory_space<vmem>>, vector<1x128x128xbf16>
    %108 = vector.shape_cast %107 : vector<1x128x128xbf16> to vector<128x128xbf16>
    %cst_61 = arith.constant dense<0.000000e+00> : vector<16x128xf32>
    %109 = tpu.matmul %106, %108, %cst_61 {dimension_numbers = #tpu.dot_dimension_numbers<[1], [0], [0], [1], [0, 0, 1, 1], [], []>} : vector<16x128xbf16>, vector<128x128xbf16>, vector<16x128xf32> -> vector<16x128xf32>
    %c1_62 = arith.constant 1 : index
    %c0_63 = arith.constant 0 : index
    %c0_64 = arith.constant 0 : index
    %110 = vector.load %arg5[%c1_62, %c0_63, %c0_64] : memref<2x1x128xf32, #tpu.memory_space<vmem>>, vector<1x1x128xf32>
    %111 = vector.shape_cast %110 : vector<1x1x128xf32> to vector<1x128xf32>
    %112 = vector.broadcast %111 : vector<1x128xf32> to vector<16x128xf32>
    %113 = arith.addf %109, %112 : vector<16x128xf32>
    %114 = arith.truncf %113 : vector<16x128xf32> to vector<16x128xbf16>
    %c1_65 = arith.constant 1 : index
    %c0_66 = arith.constant 0 : index
    %c0_67 = arith.constant 0 : index
    %115 = vector.load %arg6[%c1_65, %c0_66, %c0_67] : memref<2x128x128xbf16, #tpu.memory_space<vmem>>, vector<1x128x128xbf16>
    %116 = vector.shape_cast %115 : vector<1x128x128xbf16> to vector<128x128xbf16>
    %cst_68 = arith.constant dense<0.000000e+00> : vector<16x128xf32>
    %117 = tpu.matmul %114, %116, %cst_68 {dimension_numbers = #tpu.dot_dimension_numbers<[1], [0], [0], [1], [0, 0, 1, 1], [], []>} : vector<16x128xbf16>, vector<128x128xbf16>, vector<16x128xf32> -> vector<16x128xf32>
    %c1_69 = arith.constant 1 : index
    %c0_70 = arith.constant 0 : index
    %c0_71 = arith.constant 0 : index
    %118 = vector.load %arg7[%c1_69, %c0_70, %c0_71] : memref<2x1x128xf32, #tpu.memory_space<vmem>>, vector<1x1x128xf32>
    %119 = vector.shape_cast %118 : vector<1x1x128xf32> to vector<1x128xf32>
    %120 = vector.broadcast %119 : vector<1x128xf32> to vector<16x128xf32>
    %121 = arith.addf %117, %120 : vector<16x128xf32>
    %122 = arith.addf %101, %121 : vector<16x128xf32>
    %cst_72 = arith.constant dense<0.000000e+00> : vector<16xf32>
    %123 = vector.multi_reduction <add>, %122, %cst_72 [1] : vector<16x128xf32> to vector<16xf32>
    %124 = vector.shape_cast %123 : vector<16xf32> to vector<16x1xf32>
    %cst_73 = arith.constant 1.280000e+02 : f32
    %125 = vector.broadcast %cst_73 : f32 to vector<16x1xf32>
    %126 = arith.divf %124, %125 : vector<16x1xf32>
    %127 = vector.broadcast %126 : vector<16x1xf32> to vector<16x128xf32>
    %128 = arith.subf %122, %127 : vector<16x128xf32>
    %129 = arith.mulf %128, %128 : vector<16x128xf32>
    %cst_74 = arith.constant dense<0.000000e+00> : vector<16xf32>
    %130 = vector.multi_reduction <add>, %129, %cst_74 [1] : vector<16x128xf32> to vector<16xf32>
    %131 = vector.shape_cast %130 : vector<16xf32> to vector<16x1xf32>
    %cst_75 = arith.constant 1.280000e+02 : f32
    %132 = vector.broadcast %cst_75 : f32 to vector<16x1xf32>
    %133 = arith.divf %131, %132 : vector<16x1xf32>
    %134 = vector.broadcast %126 : vector<16x1xf32> to vector<16x128xf32>
    %135 = arith.subf %122, %134 : vector<16x128xf32>
    %cst_76 = arith.constant 9.99999974E-6 : f32
    %136 = vector.broadcast %cst_76 : f32 to vector<16x1xf32>
    %137 = arith.addf %133, %136 : vector<16x1xf32>
    %138 = math.rsqrt %137 : vector<16x1xf32>
    %139 = vector.broadcast %138 : vector<16x1xf32> to vector<16x128xf32>
    %140 = arith.mulf %135, %139 : vector<16x128xf32>
    %141 = vector.broadcast %103 : vector<1x128xf32> to vector<16x128xf32>
    %142 = arith.mulf %140, %141 : vector<16x128xf32>
    %143 = vector.broadcast %105 : vector<1x128xf32> to vector<16x128xf32>
    %144 = arith.addf %142, %143 : vector<16x128xf32>
    %145 = arith.truncf %144 : vector<16x128xf32> to vector<16x128xbf16>
    %c1_77 = arith.constant 1 : index
    %c0_78 = arith.constant 0 : index
    %c0_79 = arith.constant 0 : index
    %146 = vector.load %arg10[%c1_77, %c0_78, %c0_79] : memref<2x128x512xbf16, #tpu.memory_space<vmem>>, vector<1x128x512xbf16>
    %147 = vector.shape_cast %146 : vector<1x128x512xbf16> to vector<128x512xbf16>
    %cst_80 = arith.constant dense<0.000000e+00> : vector<16x512xf32>
    %148 = tpu.matmul %145, %147, %cst_80 {dimension_numbers = #tpu.dot_dimension_numbers<[1], [0], [0], [1], [0, 0, 1, 1], [], []>} : vector<16x128xbf16>, vector<128x512xbf16>, vector<16x512xf32> -> vector<16x512xf32>
    %c1_81 = arith.constant 1 : index
    %c0_82 = arith.constant 0 : index
    %c0_83 = arith.constant 0 : index
    %149 = vector.load %arg11[%c1_81, %c0_82, %c0_83] : memref<2x1x512xf32, #tpu.memory_space<vmem>>, vector<1x1x512xf32>
    %150 = vector.shape_cast %149 : vector<1x1x512xf32> to vector<1x512xf32>
    %151 = vector.broadcast %150 : vector<1x512xf32> to vector<16x512xf32>
    %152 = arith.addf %148, %151 : vector<16x512xf32>
    %153 = arith.truncf %152 : vector<16x512xf32> to vector<16x512xbf16>
    %cst_84 = arith.constant 5.000000e-01 : bf16
    %154 = vector.broadcast %cst_84 : bf16 to vector<16x512xbf16>
    %155 = arith.mulf %154, %153 : vector<16x512xbf16>
    %cst_85 = arith.constant 4.467770e-02 : bf16
    %156 = vector.broadcast %cst_85 : bf16 to vector<16x512xbf16>
    %157 = arith.mulf %156, %153 : vector<16x512xbf16>
    %158 = arith.mulf %157, %153 : vector<16x512xbf16>
    %159 = arith.mulf %158, %153 : vector<16x512xbf16>
    %160 = arith.addf %153, %159 : vector<16x512xbf16>
    %cst_86 = arith.constant 7.968750e-01 : bf16
    %161 = vector.broadcast %cst_86 : bf16 to vector<16x512xbf16>
    %162 = arith.mulf %161, %160 : vector<16x512xbf16>
    %163 = math.tanh %162 : vector<16x512xbf16>
    %cst_87 = arith.constant 1.000000e+00 : bf16
    %164 = vector.broadcast %cst_87 : bf16 to vector<16x512xbf16>
    %165 = arith.addf %164, %163 : vector<16x512xbf16>
    %166 = arith.mulf %155, %165 : vector<16x512xbf16>
    %c1_88 = arith.constant 1 : index
    %c0_89 = arith.constant 0 : index
    %c0_90 = arith.constant 0 : index
    %167 = vector.load %arg12[%c1_88, %c0_89, %c0_90] : memref<2x512x128xbf16, #tpu.memory_space<vmem>>, vector<1x512x128xbf16>
    %168 = vector.shape_cast %167 : vector<1x512x128xbf16> to vector<512x128xbf16>
    %cst_91 = arith.constant dense<0.000000e+00> : vector<16x128xf32>
    %169 = tpu.matmul %166, %168, %cst_91 {dimension_numbers = #tpu.dot_dimension_numbers<[1], [0], [0], [1], [0, 0, 1, 1], [], []>} : vector<16x512xbf16>, vector<512x128xbf16>, vector<16x128xf32> -> vector<16x128xf32>
    %c1_92 = arith.constant 1 : index
    %c0_93 = arith.constant 0 : index
    %c0_94 = arith.constant 0 : index
    %170 = vector.load %arg13[%c1_92, %c0_93, %c0_94] : memref<2x1x128xf32, #tpu.memory_space<vmem>>, vector<1x1x128xf32>
    %171 = vector.shape_cast %170 : vector<1x1x128xf32> to vector<1x128xf32>
    %172 = vector.broadcast %171 : vector<1x128xf32> to vector<16x128xf32>
    %173 = arith.addf %169, %172 : vector<16x128xf32>
    %174 = arith.addf %144, %173 : vector<16x128xf32>
    %cst_95 = arith.constant dense<0.000000e+00> : vector<16xf32>
    %175 = vector.multi_reduction <add>, %174, %cst_95 [1] : vector<16x128xf32> to vector<16xf32>
    %176 = vector.shape_cast %175 : vector<16xf32> to vector<16x1xf32>
    %cst_96 = arith.constant 1.280000e+02 : f32
    %177 = vector.broadcast %cst_96 : f32 to vector<16x1xf32>
    %178 = arith.divf %176, %177 : vector<16x1xf32>
    %179 = vector.broadcast %178 : vector<16x1xf32> to vector<16x128xf32>
    %180 = arith.subf %174, %179 : vector<16x128xf32>
    %181 = arith.mulf %180, %180 : vector<16x128xf32>
    %cst_97 = arith.constant dense<0.000000e+00> : vector<16xf32>
    %182 = vector.multi_reduction <add>, %181, %cst_97 [1] : vector<16x128xf32> to vector<16xf32>
    %183 = vector.shape_cast %182 : vector<16xf32> to vector<16x1xf32>
    %cst_98 = arith.constant 1.280000e+02 : f32
    %184 = vector.broadcast %cst_98 : f32 to vector<16x1xf32>
    %185 = arith.divf %183, %184 : vector<16x1xf32>
    %186 = vector.broadcast %178 : vector<16x1xf32> to vector<16x128xf32>
    %187 = arith.subf %174, %186 : vector<16x128xf32>
    %cst_99 = arith.constant 9.99999974E-6 : f32
    %188 = vector.broadcast %cst_99 : f32 to vector<16x1xf32>
    %189 = arith.addf %185, %188 : vector<16x1xf32>
    %190 = math.rsqrt %189 : vector<16x1xf32>
    %191 = vector.broadcast %190 : vector<16x1xf32> to vector<16x128xf32>
    %192 = arith.mulf %187, %191 : vector<16x128xf32>
    %193 = vector.broadcast %103 : vector<1x128xf32> to vector<16x128xf32>
    %194 = arith.mulf %192, %193 : vector<16x128xf32>
    %195 = vector.broadcast %105 : vector<1x128xf32> to vector<16x128xf32>
    %196 = arith.addf %194, %195 : vector<16x128xf32>
    %c0_100 = arith.constant 0 : index
    %c0_101 = arith.constant 0 : index
    %197 = vector.load %arg14[%c0_100, %c0_101] : memref<1x128xf32, #tpu.memory_space<vmem>>, vector<1x128xf32>
    %c0_102 = arith.constant 0 : index
    %c0_103 = arith.constant 0 : index
    %198 = vector.load %arg15[%c0_102, %c0_103] : memref<1x128xf32, #tpu.memory_space<vmem>>, vector<1x128xf32>
    %cst_104 = arith.constant dense<0.000000e+00> : vector<16xf32>
    %199 = vector.multi_reduction <add>, %196, %cst_104 [1] : vector<16x128xf32> to vector<16xf32>
    %200 = vector.shape_cast %199 : vector<16xf32> to vector<16x1xf32>
    %cst_105 = arith.constant 1.280000e+02 : f32
    %201 = vector.broadcast %cst_105 : f32 to vector<16x1xf32>
    %202 = arith.divf %200, %201 : vector<16x1xf32>
    %203 = vector.broadcast %202 : vector<16x1xf32> to vector<16x128xf32>
    %204 = arith.subf %196, %203 : vector<16x128xf32>
    %205 = arith.mulf %204, %204 : vector<16x128xf32>
    %cst_106 = arith.constant dense<0.000000e+00> : vector<16xf32>
    %206 = vector.multi_reduction <add>, %205, %cst_106 [1] : vector<16x128xf32> to vector<16xf32>
    %207 = vector.shape_cast %206 : vector<16xf32> to vector<16x1xf32>
    %cst_107 = arith.constant 1.280000e+02 : f32
    %208 = vector.broadcast %cst_107 : f32 to vector<16x1xf32>
    %209 = arith.divf %207, %208 : vector<16x1xf32>
    %210 = vector.broadcast %202 : vector<16x1xf32> to vector<16x128xf32>
    %211 = arith.subf %196, %210 : vector<16x128xf32>
    %cst_108 = arith.constant 9.99999974E-6 : f32
    %212 = vector.broadcast %cst_108 : f32 to vector<16x1xf32>
    %213 = arith.addf %209, %212 : vector<16x1xf32>
    %214 = math.rsqrt %213 : vector<16x1xf32>
    %215 = vector.broadcast %214 : vector<16x1xf32> to vector<16x128xf32>
    %216 = arith.mulf %211, %215 : vector<16x128xf32>
    %217 = vector.broadcast %197 : vector<1x128xf32> to vector<16x128xf32>
    %218 = arith.mulf %216, %217 : vector<16x128xf32>
    %219 = vector.broadcast %198 : vector<1x128xf32> to vector<16x128xf32>
    %220 = arith.addf %218, %219 : vector<16x128xf32>
    %221 = arith.truncf %220 : vector<16x128xf32> to vector<16x128xbf16>
    %c0_109 = arith.constant 0 : index
    %c0_110 = arith.constant 0 : index
    %222 = vector.load %arg16[%c0_109, %c0_110] : memref<128x128xbf16, #tpu.memory_space<vmem>>, vector<128x128xbf16>
    %cst_111 = arith.constant dense<0.000000e+00> : vector<16x128xf32>
    %223 = tpu.matmul %221, %222, %cst_111 {dimension_numbers = #tpu.dot_dimension_numbers<[1], [0], [0], [1], [0, 0, 1, 1], [], []>} : vector<16x128xbf16>, vector<128x128xbf16>, vector<16x128xf32> -> vector<16x128xf32>
    %c0_112 = arith.constant 0 : index
    %c0_113 = arith.constant 0 : index
    %224 = vector.load %arg17[%c0_112, %c0_113] : memref<1x128xf32, #tpu.memory_space<vmem>>, vector<1x128xf32>
    %225 = vector.broadcast %224 : vector<1x128xf32> to vector<16x128xf32>
    %226 = arith.addf %223, %225 : vector<16x128xf32>
    %cst_114 = arith.constant 5.000000e-01 : f32
    %227 = vector.broadcast %cst_114 : f32 to vector<16x128xf32>
    %228 = arith.mulf %227, %226 : vector<16x128xf32>
    %cst_115 = arith.constant 4.471500e-02 : f32
    %229 = vector.broadcast %cst_115 : f32 to vector<16x128xf32>
    %230 = arith.mulf %229, %226 : vector<16x128xf32>
    %231 = arith.mulf %230, %226 : vector<16x128xf32>
    %232 = arith.mulf %231, %226 : vector<16x128xf32>
    %233 = arith.addf %226, %232 : vector<16x128xf32>
    %cst_116 = arith.constant 0.797884583 : f32
    %234 = vector.broadcast %cst_116 : f32 to vector<16x128xf32>
    %235 = arith.mulf %234, %233 : vector<16x128xf32>
    %236 = math.tanh %235 : vector<16x128xf32>
    %cst_117 = arith.constant 1.000000e+00 : f32
    %237 = vector.broadcast %cst_117 : f32 to vector<16x128xf32>
    %238 = arith.addf %237, %236 : vector<16x128xf32>
    %239 = arith.mulf %228, %238 : vector<16x128xf32>
    %c0_118 = arith.constant 0 : index
    %c0_119 = arith.constant 0 : index
    %240 = vector.load %arg18[%c0_118, %c0_119] : memref<1x128xf32, #tpu.memory_space<vmem>>, vector<1x128xf32>
    %241 = vector.broadcast %240 : vector<1x128xf32> to vector<16x128xf32>
    %242 = arith.mulf %239, %241 : vector<16x128xf32>
    %cst_120 = arith.constant dense<0.000000e+00> : vector<16xf32>
    %243 = vector.multi_reduction <add>, %242, %cst_120 [1] : vector<16x128xf32> to vector<16xf32>
    %244 = vector.shape_cast %243 : vector<16xf32> to vector<16x1xf32>
    %c0_121 = arith.constant 0 : index
    %c0_122 = arith.constant 0 : index
    %245 = memref.load %arg19[%c0_121, %c0_122] : memref<1x1xf32, #tpu.memory_space<smem>>
    %246 = vector.broadcast %245 : f32 to vector<16x1xf32>
    %247 = arith.addf %244, %246 : vector<16x1xf32>
    %c0_123 = arith.constant 0 : index
    %c0_124 = arith.constant 0 : index
    %248 = vector.load %arg20[%c0_123, %c0_124] : memref<16x1xf32, #tpu.memory_space<vmem>>, vector<16x1xf32>
    tpu.vector_store %arg20[%c0_123, %c0_124], %247 {strides = array<i32>} : memref<16x1xf32, #tpu.memory_space<vmem>>, vector<16x1xf32>,
    return
  }
  func.func @transform_0(%arg0: i32) -> (i32, i32) {
    %c0_i32 = arith.constant 0 : i32
    %c0_i32_0 = arith.constant 0 : i32
    return %arg0, %c0_i32 : i32, i32
  }
  func.func @transform_1(%arg0: i32) -> (i32, i32) {
    %c0_i32 = arith.constant 0 : i32
    %c0_i32_0 = arith.constant 0 : i32
    %c0_i32_1 = arith.constant 0 : i32
    return %c0_i32, %c0_i32_0 : i32, i32
  }
  func.func @transform_2(%arg0: i32) -> (i32, i32) {
    %c0_i32 = arith.constant 0 : i32
    %c0_i32_0 = arith.constant 0 : i32
    %c0_i32_1 = arith.constant 0 : i32
    return %c0_i32, %c0_i32_0 : i32, i32
  }
  func.func @transform_3(%arg0: i32) -> (i32, i32, i32) {
    %c0_i32 = arith.constant 0 : i32
    %c0_i32_0 = arith.constant 0 : i32
    %c0_i32_1 = arith.constant 0 : i32
    %c0_i32_2 = arith.constant 0 : i32
    return %c0_i32, %c0_i32_0, %c0_i32_1 : i32, i32, i32
  }
  func.func @transform_4(%arg0: i32) -> (i32, i32, i32) {
    %c0_i32 = arith.constant 0 : i32
    %c0_i32_0 = arith.constant 0 : i32
    %c0_i32_1 = arith.constant 0 : i32
    %c0_i32_2 = arith.constant 0 : i32
    return %c0_i32, %c0_i32_0, %c0_i32_1 : i32, i32, i32
  }
  func.func @transform_5(%arg0: i32) -> (i32, i32, i32) {
    %c0_i32 = arith.constant 0 : i32
    %c0_i32_0 = arith.constant 0 : i32
    %c0_i32_1 = arith.constant 0 : i32
    %c0_i32_2 = arith.constant 0 : i32
    return %c0_i32, %c0_i32_0, %c0_i32_1 : i32, i32, i32
  }
  func.func @transform_6(%arg0: i32) -> (i32, i32, i32) {
    %c0_i32 = arith.constant 0 : i32
    %c0_i32_0 = arith.constant 0 : i32
    %c0_i32_1 = arith.constant 0 : i32
    %c0_i32_2 = arith.constant 0 : i32
    return %c0_i32, %c0_i32_0, %c0_i32_1 : i32, i32, i32
  }
  func.func @transform_7(%arg0: i32) -> (i32, i32, i32) {
    %c0_i32 = arith.constant 0 : i32
    %c0_i32_0 = arith.constant 0 : i32
    %c0_i32_1 = arith.constant 0 : i32
    %c0_i32_2 = arith.constant 0 : i32
    return %c0_i32, %c0_i32_0, %c0_i32_1 : i32, i32, i32
  }
  func.func @transform_8(%arg0: i32) -> (i32, i32, i32) {
    %c0_i32 = arith.constant 0 : i32
    %c0_i32_0 = arith.constant 0 : i32
    %c0_i32_1 = arith.constant 0 : i32
    %c0_i32_2 = arith.constant 0 : i32
    return %c0_i32, %c0_i32_0, %c0_i32_1 : i32, i32, i32
  }
  func.func @transform_9(%arg0: i32) -> (i32, i32, i32) {
    %c0_i32 = arith.constant 0 : i32
    %c0_i32_0 = arith.constant 0 : i32
    %c0_i32_1 = arith.constant 0 : i32
    %c0_i32_2 = arith.constant 0 : i32
    return %c0_i32, %c0_i32_0, %c0_i32_1 : i32, i32, i32
  }
  func.func @transform_10(%arg0: i32) -> (i32, i32, i32) {
    %c0_i32 = arith.constant 0 : i32
    %c0_i32_0 = arith.constant 0 : i32
    %c0_i32_1 = arith.constant 0 : i32
    %c0_i32_2 = arith.constant 0 : i32
    return %c0_i32, %c0_i32_0, %c0_i32_1 : i32, i32, i32
  }
  func.func @transform_11(%arg0: i32) -> (i32, i32, i32) {
    %c0_i32 = arith.constant 0 : i32
    %c0_i32_0 = arith.constant 0 : i32
    %c0_i32_1 = arith.constant 0 : i32
    %c0_i32_2 = arith.constant 0 : i32
    return %c0_i32, %c0_i32_0, %c0_i32_1 : i32, i32, i32
  }
  func.func @transform_12(%arg0: i32) -> (i32, i32, i32) {
    %c0_i32 = arith.constant 0 : i32
    %c0_i32_0 = arith.constant 0 : i32
    %c0_i32_1 = arith.constant 0 : i32
    %c0_i32_2 = arith.constant 0 : i32
    return %c0_i32, %c0_i32_0, %c0_i32_1 : i32, i32, i32
  }
  func.func @transform_13(%arg0: i32) -> (i32, i32) {
    %c0_i32 = arith.constant 0 : i32
    %c0_i32_0 = arith.constant 0 : i32
    %c0_i32_1 = arith.constant 0 : i32
    return %c0_i32, %c0_i32_0 : i32, i32
  }
  func.func @transform_14(%arg0: i32) -> (i32, i32) {
    %c0_i32 = arith.constant 0 : i32
    %c0_i32_0 = arith.constant 0 : i32
    %c0_i32_1 = arith.constant 0 : i32
    return %c0_i32, %c0_i32_0 : i32, i32
  }
  func.func @transform_15(%arg0: i32) -> (i32, i32) {
    %c0_i32 = arith.constant 0 : i32
    %c0_i32_0 = arith.constant 0 : i32
    %c0_i32_1 = arith.constant 0 : i32
    return %c0_i32, %c0_i32_0 : i32, i32
  }
  func.func @transform_16(%arg0: i32) -> (i32, i32) {
    %c0_i32 = arith.constant 0 : i32
    %c0_i32_0 = arith.constant 0 : i32
    %c0_i32_1 = arith.constant 0 : i32
    return %c0_i32, %c0_i32_0 : i32, i32
  }
  func.func @transform_17(%arg0: i32) -> (i32, i32) {
    %c0_i32 = arith.constant 0 : i32
    %c0_i32_0 = arith.constant 0 : i32
    %c0_i32_1 = arith.constant 0 : i32
    return %c0_i32, %c0_i32_0 : i32, i32
  }
  func.func @transform_18(%arg0: i32) -> (i32, i32) {
    %c0_i32 = arith.constant 0 : i32
    %c0_i32_0 = arith.constant 0 : i32
    %c0_i32_1 = arith.constant 0 : i32
    return %c0_i32, %c0_i32_0 : i32, i32
  }
  func.func @transform_19(%arg0: i32) -> (i32, i32) {
    %c0_i32 = arith.constant 0 : i32
    %c0_i32_0 = arith.constant 0 : i32
    return %arg0, %c0_i32 : i32, i32
  }
}

</mosaic_0001>

<bundles_post_ra>
// kernel: tpu_custom_call.1
= control target key start
LH: loop header
LB: loop body
LE: loop exit
PB: predicated region body
PF: predicated region fallthrough
CT: control target
= control target key end

     0   :  { %s3667_s0 = inlined_call_operand.hbm [shape: f32[16,64], index: 0, kind: input, shape index: {}]   ;;  %s3668_s1 = inlined_call_operand.hbm [shape: bf16[64,128], index: 1, kind: input, shape index: {}]   ;;  %s3669_s2 = inlined_call_operand.hbm [shape: f32[1,128], index: 2, kind: input, shape index: {}]   ;;  %s3670_s3 = inlined_call_operand.hbm [shape: bf16[2,128,128], index: 3, kind: input, shape index: {}]   ;;  %s3671_s4 = inlined_call_operand.vmem [shape: f32[2,1,128], index: 4, kind: input, shape index: {}]   ;;  %s3672_s5 = inlined_call_operand.hbm [shape: bf16[2,128,128], index: 5, kind: input, shape index: {}]   ;;  %s3673_s6 = inlined_call_operand.vmem [shape: f32[2,1,128], index: 6, kind: input, shape index: {}]   ;;  %s3674_s7 = inlined_call_operand.vmem [shape: f32[2,1,128], index: 7, kind: input, shape index: {}]   ;;  %s3675_s8 = inlined_call_operand.vmem [shape: f32[2,1,128], index: 8, kind: input, shape index: {}]   ;;  %s3676_s9 = inlined_call_operand.hbm [shape: bf16[2,128,512], index: 9, kind: input, shape index: {}]   ;;  %s3677_s10 = inlined_call_operand.vmem [shape: f32[2,1,512], index: 10, kind: input, shape index: {}]   ;;  %s3678_s11 = inlined_call_operand.hbm [shape: bf16[2,512,128], index: 11, kind: input, shape index: {}]   ;;  %s3679_s12 = inlined_call_operand.vmem [shape: f32[2,1,128], index: 12, kind: input, shape index: {}]   ;;  %s3680_s13 = inlined_call_operand.vmem [shape: f32[1,128], index: 13, kind: input, shape index: {}]   ;;  %s3681_s14 = inlined_call_operand.vmem [shape: f32[1,128], index: 14, kind: input, shape index: {}]   ;;  %s3682_s15 = inlined_call_operand.hbm [shape: bf16[128,128], index: 15, kind: input, shape index: {}]   ;;  %s3683_s16 = inlined_call_operand.vmem [shape: f32[1,128], index: 16, kind: input, shape index: {}]   ;;  %s3684_s17 = inlined_call_operand.vmem [shape: f32[1,128], index: 17, kind: input, shape index: {}]   ;;  %s3685_s18 = inlined_call_operand.<no memory space> [shape: f32[1,1], index: 18, kind: input, shape index: {}]   ;;  %s3686_s19 = inlined_call_operand.vmem [shape: f32[16,1], index: 19, kind: output, shape index: {}]  }
   0x1   :  { %3691 = sst [smem:[#allocation21_spill]] %s3667_s0 }
   0x2   :  { %3692 = sst [smem:[#allocation22_spill]] %s3668_s1 }
   0x3   :  { %3693 = sst [smem:[#allocation23_spill]] %s3669_s2 }
   0x4   :  { %3694 = sst [smem:[#allocation24_spill]] %s3670_s3 }
   0x5   :  { %25 = vsyncpa [#allocation4], 0 }
   0x6   :  { %26 = vsyncpa [#allocation6], 0 }
   0x7   :  { %27 = vsyncpa [#allocation9], 0 }
   0x8   :  { %28 = vsyncpa [#allocation12], 0 }
   0x9   :  { %29 = vsyncpa [#allocation15], 0  ;;  %s3312_s0 = smov [#allocation5]  }
   0xa   :  { %s47_s30 = sshll.u32 %s3312_s0, 4  ;;  %s48_s30 = int_to_ptr.vmem [resolvable:$true] %s47_s30 }
   0xb   :  { %s3150_s20 = scalar_lea.vmem %s48_s30, 512  ;;  %p3155_p1 = scmp.lt.s32.totalorder %s48_s30, %s48_s30 }
   0xc   :  { %p3151_p0 = scmp.ne.s32.totalorder %s48_s30, %s3150_s20  ;;  %p3156_p2 = scmp.lt.s32.totalorder %s3150_s20, %s3150_s20 }
   0xe   :  { %p3157_p3 = por %p3156_p2, %p3155_p1 }
  0x10   :  { %p3158_p4 = pnand %p3157_p3, %p3151_p0 }
  0x12   :  { %3161 = shalt.err (!%p3158_p4)
}
  0x13   :  { %s3687_s21 = smov 64   ;;  %s3689_s1 = smov 4  }
  0x14   :  { %s3695_s23 = sld [smem:[#allocation22_spill]]  ;;  %s3315_s24 = smov [#allocation8]  }
  0x15   :  { %s69_s25 = sshll.u32 %s3315_s24, 4  ;;  %s3316_s3 = smov [#allocation11]   ;;  %s70_s25 = int_to_ptr.vmem [resolvable:$true] %s69_s25 }
  0x16   :  { %s101_s26 = sshll.u32 %s3316_s3, 4  ;;  %s3170_s27 = scalar_lea.vmem %s70_s25, 2048  ;;  %s102_s26 = int_to_ptr.vmem [resolvable:$true] %s101_s26 }
  0x17   :  { %p3171_p5 = scmp.ne.s32.totalorder %s70_s25, %s3170_s27  ;;  %p3175_p6 = scmp.lt.s32.totalorder %s70_s25, %s70_s25 }
  0x18   :  { %p3176_p7 = scmp.lt.s32.totalorder %s3170_s27, %s3170_s27 }
  0x1a   :  { %53 = dma.hbm_to_vmem [thread:$0]  %s3695_s23, 512, %s48_s30, [#allocation6], %s3687_s21, %s3687_s21, %s3689_s1  }
  0x1b   :  { %p3177_p8 = por %p3176_p7, %p3175_p6 }
  0x1d   :  { %p3178_p9 = pnand %p3177_p8, %p3171_p5 }
  0x1f   :  { %3181 = shalt.err (!%p3178_p9)
}
  0x20   :  { %s3696_s0 = sld [smem:[#allocation24_spill]]  ;;  %s3190_s30 = scalar_lea.vmem %s102_s26, 8192 }
  0x21   :  { %p3191_p10 = scmp.ne.s32.totalorder %s102_s26, %s3190_s30  ;;  %p3195_p11 = scmp.lt.s32.totalorder %s102_s26, %s102_s26 }
  0x22   :  { %p3196_p12 = scmp.lt.s32.totalorder %s3190_s30, %s3190_s30 }
  0x24   :  { %p3197_p13 = por %p3196_p12, %p3195_p11 }
  0x26   :  { %75 = dma.hbm_to_vmem [thread:$0]  %s3696_s0, 2048, %s70_s25, [#allocation9], %s3687_s21, %s3687_s21, %s3689_s1  }
  0x27   :  { %p3198_p0 = pnand %p3197_p13, %p3191_p10 }
  0x29   :  { %3201 = shalt.err (!%p3198_p0)
}
  0x2a   :  { %s3317_s20 = smov 256   ;;  %s3318_s22 = smov 16  }
  0x2b   :  { %107 = dma.hbm_to_vmem [thread:$0]  %s3676_s9, 8192, %s102_s26, [#allocation12], %s3317_s20, %s3317_s20, %s3318_s22  }
  0x2c   :  { %s3319_s24 = smov [#allocation3]  }
  0x2d   :  { %s35_s3 = sshll.u32 %s3319_s24, 4  ;;  %s36_s3 = int_to_ptr.vmem [resolvable:$true] %s35_s3 }
  0x2e   :  { %s3210_s27 = scalar_lea.vmem %s36_s3, 256  ;;  %p3215_p2 = scmp.lt.s32.totalorder %s36_s3, %s36_s3 }
  0x2f   :  { %p3211_p1 = scmp.ne.s32.totalorder %s36_s3, %s3210_s27  ;;  %p3216_p3 = scmp.lt.s32.totalorder %s3210_s27, %s3210_s27 }
  0x31   :  { %p3217_p4 = por %p3216_p3, %p3215_p2 }
  0x33   :  { %p3218_p5 = pnand %p3217_p4, %p3211_p1 }
  0x35   :  { %3221 = shalt.err (!%p3218_p5)
}
  0x36   :  { %s3320_s25 = smov 128   ;;  %s3321_s28 = smov 8  }
  0x37   :  { %s3697_s30 = sld [smem:[#allocation21_spill]]  ;;  %s3322_s21 = smov [#allocation7]  }
  0x38   :  { %s60_s1 = sshll.u32 %s3322_s21, 4  ;;  %s3323_s2 = smov [#allocation10]   ;;  %s61_s1 = int_to_ptr.vmem [resolvable:$true] %s60_s1 }
  0x39   :  { %s83_s9 = sshll.u32 %s3323_s2, 4  ;;  %s3230_s26 = scalar_lea.vmem %s61_s1, 16  ;;  %s84_s9 = int_to_ptr.vmem [resolvable:$true] %s83_s9 }
  0x3a   :  { %p3231_p6 = scmp.ne.s32.totalorder %s61_s1, %s3230_s26  ;;  %s3234_s20 = scalar_lea.vmem %s61_s1, 32 }
  0x3b   :  { %p3235_p7 = scmp.lt.s32.totalorder %s61_s1, %s61_s1  ;;  %p3236_p8 = scmp.lt.s32.totalorder %s3234_s20, %s3230_s26 }
  0x3d   :  { %41 = dma.hbm_to_vmem [thread:$0]  %s3697_s30, 256, %s36_s3, [#allocation4], %s3320_s25, %s3320_s25, %s3321_s28  }
  0x3e   :  { %p3237_p9 = por %p3236_p8, %p3235_p7 }
  0x40   :  { %p3238_p10 = pnand %p3237_p9, %p3231_p6 }
  0x42   :  { %3241 = shalt.err (!%p3238_p10)
}
  0x43   :  { %s3698_s24 = sld [smem:[#allocation23_spill]]  ;;  %s3250_s27 = scalar_lea.vmem %s84_s9, 2048 }
  0x44   :  { %p3251_p11 = scmp.ne.s32.totalorder %s84_s9, %s3250_s27  ;;  %p3255_p12 = scmp.lt.s32.totalorder %s84_s9, %s84_s9 }
  0x45   :  { %p3256_p13 = scmp.lt.s32.totalorder %s3250_s27, %s3250_s27 }
  0x47   :  { %p3257_p0 = por %p3256_p13, %p3255_p12 }
  0x49   :  { %63 = dma.hbm_to_vmem [thread:$0]  %s3698_s24, 16, %s61_s1, [#allocation6]  }
  0x4a   :  { %p3258_p1 = pnand %p3257_p0, %p3251_p11 }
  0x4c   :  { %3261 = shalt.err (!%p3258_p1)
}
  0x4d   :  { %s3699_s21 = smov 4   ;;  %s3700_s3 = smov 64  }
  0x4e   :  { %89 = dma.hbm_to_vmem [thread:$0]  %s3672_s5, 2048, %s84_s9, [#allocation9], %s3700_s3, %s3700_s3, %s3699_s21  }
  0x4f   :  { %s3324_s29 = smov [#allocation13]   ;;  %s3325_s30 = smov [#allocation14]  }
  0x50   :  { %s115_s0 = sshll.u32 %s3324_s29, 4  ;;  %s133_s2 = sshll.u32 %s3325_s30, 4  ;;  %s116_s0 = int_to_ptr.vmem [resolvable:$true] %s115_s0  ;;  %s134_s2 = int_to_ptr.vmem [resolvable:$true] %s133_s2 }
  0x51   :  { %s3270_s1 = scalar_lea.vmem %s116_s0, 8192  ;;  %p3275_p3 = scmp.lt.s32.totalorder %s116_s0, %s116_s0 }
  0x52   :  { %p3271_p2 = scmp.ne.s32.totalorder %s116_s0, %s3270_s1  ;;  %p3276_p4 = scmp.lt.s32.totalorder %s3270_s1, %s3270_s1 }
  0x54   :  { %p3277_p5 = por %p3276_p4, %p3275_p3 }
  0x56   :  { %p3278_p6 = pnand %p3277_p5, %p3271_p2 }
  0x58   :  { %3281 = shalt.err (!%p3278_p6)
}
  0x59   :  { %121 = dma.hbm_to_vmem [thread:$0]  %s3678_s11, 8192, %s116_s0, [#allocation12], %s3700_s3, %s3700_s3, %s3699_s21  }
  0x5a   :  { %s3290_s5 = scalar_lea.vmem %s134_s2, 1024  ;;  %p3295_p8 = scmp.lt.s32.totalorder %s134_s2, %s134_s2 }
  0x5b   :  { %p3291_p7 = scmp.ne.s32.totalorder %s134_s2, %s3290_s5  ;;  %p3296_p9 = scmp.lt.s32.totalorder %s3290_s5, %s3290_s5 }
  0x5d   :  { %p3297_p10 = por %p3296_p9, %p3295_p8 }
  0x5f   :  { %p3298_p11 = pnand %p3297_p10, %p3291_p7 }
  0x61   :  { %3301 = shalt.err (!%p3298_p11)
}
  0x62   :  { %139 = dma.hbm_to_vmem [thread:$0]  %s3682_s15, 1024, %s134_s2, [#allocation15], %s3700_s3, %s3700_s3, %s3699_s21  }
  0x63   :  { %3302 = dma.done.wait [#allocation4], 256  }
  0x64   :  { %3303 = vsyncadd [#allocation4], 4294967040 }
  0x65   :  { %3304 = dma.done.wait [#allocation6], 528  }
  0x66   :  { %3305 = vsyncadd [#allocation6], 4294966768 }
  0x67   :  { %3306 = dma.done.wait [#allocation9], 4096  }
  0x68   :  { %3307 = vsyncadd [#allocation9], 4294963200 }
  0x69   :  { %3308 = dma.done.wait [#allocation12], 16384  }
  0x6a   :  { %3309 = vsyncadd [#allocation12], 4294950912 }
  0x6b   :  { %3310 = dma.done.wait [#allocation15], 1024  }
  0x6c   :  { %3311 = vsyncadd [#allocation15], 4294966272  ;;  %v3326_v0 = vmov 0.0   ;;  %vm3327_vm0 = vmmov 0   ;;  %v2898_v1 = vld [vmem:[#allocation5 + $0x18] sm:$0xff]   ;;  %v2899_v2 = vld [vmem:[#allocation5 + $0x10] sm:$0xff]  }
  0x6d   :  { %2769 = vmatprep.subr.bf16.mxu0 %v3326_v0  ;;  %2777 = vmatprep.mubr.msk.bf16.mxu0 %vm3327_vm0, %v3326_v0  ;;  %v2902_v3 = vld [vmem:[#allocation8 + $0x38] sm:$0xff]   ;;  %v2900_v4 = vld [vmem:[#allocation5 + $0x8] sm:$0xff]   ;;  %v2903_v5 = vld [vmem:[#allocation8 + $0x30] sm:$0xff]   ;;  %vm217_vm1 = vcmask 523264   ;;  %vm2425_vm2 = vcmask 7168  }
  0x6e   :  { %2781 = vmatprep.subr.bf16.mxu1 %v3326_v0  ;;  %2797 = vmatprep.mubr.msk.bf16.mxu1 %vm3327_vm0, %v3326_v0  ;;  %v2901_v6 = vld [vmem:[#allocation5] sm:$0xff]   ;;  %v175_v7 = vld [vmem:[#allocation3] sm:$0xff]  ;;  %v176_v8 = vld [vmem:[#allocation3 + $0x8] sm:$0xff] }
  0x6f   :  { %2770 = vmatpush3.bf16.msra.mxu0 %v2898_v1  ;;  %2782 = vmatpush3.bf16.msra.mxu1 %v2902_v3  ;;  %v2904_v9 = vld [vmem:[#allocation8 + $0x28] sm:$0xff]   ;;  %v177_v10 = vpack.c.bf16 %v176_v8, %v175_v7  ;;  %v2905_v11 = vld [vmem:[#allocation8 + $0x20] sm:$0xff]   ;;  %v2906_v12 = vld [vmem:[#allocation8 + $0x18] sm:$0xff]  }
  0x70   :  { %2771 = vmatprep.subr.bf16.mxu0 %v3326_v0  ;;  %2783 = vmatprep.subr.bf16.mxu1 %v3326_v0  ;;  %v2907_v13 = vld [vmem:[#allocation8 + $0x10] sm:$0xff]   ;;  %v2908_v14 = vld [vmem:[#allocation8 + $0x8] sm:$0xff]   ;;  %v2909_v15 = vld [vmem:[#allocation8] sm:$0xff]  }
  0x71   :  { %v2910_v16 = vld [vmem:[#allocation10 + $0x38] sm:$0xff]   ;;  %v2911_v17 = vld [vmem:[#allocation10 + $0x30] sm:$0xff]   ;;  %v2912_v18 = vld [vmem:[#allocation10 + $0x28] sm:$0xff]  }
  0x72   :  { %v2913_v19 = vld [vmem:[#allocation10 + $0x20] sm:$0xff]   ;;  %v2914_v20 = vld [vmem:[#allocation10 + $0x18] sm:$0xff]   ;;  %v2915_v21 = vld [vmem:[#allocation10 + $0x10] sm:$0xff]  }
  0x73   :  { %2772 = vmatpush3.bf16.msra.mxu0 %v2899_v2  ;;  %2784 = vmatpush3.bf16.msra.mxu1 %v2903_v5  ;;  %v2437_v23 = vld [vmem:[#allocation7] ss:$0 sm:$0xff]  ;;  %v2916_v30 = vld [vmem:[#allocation10 + $0x8] sm:$0xff]   ;;  %v2917_v31 = vld [vmem:[#allocation10] sm:$0xff]  }
  0x74   :  { %2773 = vmatprep.subr.bf16.mxu0 %v3326_v0  ;;  %2785 = vmatprep.subr.bf16.mxu1 %v3326_v0  ;;  %v2443_v33 = vld [vmem:[%s3671_s4] ss:$0 sm:$0xff]  ;;  %v2918_v49 = vld [vmem:[#allocation11 + $0xe0] ss:$16 sps:$4 sm:$0xff]   ;;  %v2920_v50 = vld [vmem:[#allocation11 + $0xe4] ss:$16 sps:$4 sm:$0xff]  }
  0x75   :  { %v2452_v40 = vld [vmem:[%s3673_s6] ss:$0 sm:$0xff]  ;;  %v2921_v51 = vld [vmem:[#allocation11 + $0xe8] ss:$16 sps:$4 sm:$0xff]   ;;  %v2926_v61 = vld [vmem:[#allocation11 + $0xc4] ss:$16 sps:$4 sm:$0xff]  }
  0x76   :  { %v2923_v52 = vld [vmem:[#allocation11 + $0xec] ss:$16 sps:$4 sm:$0xff]   ;;  %v2924_v63 = vld [vmem:[#allocation11 + $0xc0] ss:$16 sps:$4 sm:$0xff]   ;;  %v2927_v1 = vld [vmem:[#allocation11 + $0xc8] ss:$16 sps:$4 sm:$0xff]  }
  0x77   :  { %2774 = vmatpush3.bf16.msra.mxu0 %v2900_v4  ;;  %2786 = vmatpush3.bf16.msra.mxu1 %v2904_v9  ;;  %v2929_v62 = vld [vmem:[#allocation11 + $0xcc] ss:$16 sps:$4 sm:$0xff]   ;;  %v2932_v2 = vld [vmem:[#allocation11 + $0xa4] ss:$16 sps:$4 sm:$0xff]   ;;  %v2930_v4 = vld [vmem:[#allocation11 + $0xa0] ss:$16 sps:$4 sm:$0xff]  }
  0x78   :  { %2775 = vmatprep.subr.bf16.mxu0 %v3326_v0  ;;  %2787 = vmatprep.subr.bf16.mxu1 %v3326_v0  ;;  %v2935_v3 = vld [vmem:[#allocation11 + $0xac] ss:$16 sps:$4 sm:$0xff]   ;;  %v2933_v5 = vld [vmem:[#allocation11 + $0xa8] ss:$16 sps:$4 sm:$0xff]   ;;  %v2938_v7 = vld [vmem:[#allocation11 + $0x84] ss:$16 sps:$4 sm:$0xff]  }
  0x79   :  { %v2939_v8 = vld [vmem:[#allocation11 + $0x88] ss:$16 sps:$4 sm:$0xff]   ;;  %v2941_v9 = vld [vmem:[#allocation11 + $0x8c] ss:$16 sps:$4 sm:$0xff]  }
  0x7b   :  { %2776 = vmatpush3.bf16.msra.mxu0 %v2901_v6  ;;  %2788 = vmatpush3.bf16.msra.mxu1 %v2905_v11  ;;  %v2936_v6 = vld [vmem:[#allocation11 + $0x80] ss:$16 sps:$4 sm:$0xff]   ;;  %v2947_v11 = vld [vmem:[#allocation11 + $0x6c] ss:$16 sps:$4 sm:$0xff]  }
  0x7c   :  { %2801 = vmatprep.subr.bf16.mxu0 %v3326_v0  ;;  %2789 = vmatprep.subr.bf16.mxu1 %v3326_v0 }
  0x7e   :  { %2778 = vmatmul.mubr.msk.bf16.vlgmr.msra.gmra.mxu0 %vm217_vm1, %v177_v10  ;;  %v2944_v10 = vld [vmem:[#allocation11 + $0x64] ss:$16 sps:$4 sm:$0xff]  }
  0x7f   :  { %2817 = vmatprep.mubr.msk.bf16.mxu0 %vm3327_vm0, %v3326_v0  ;;  %2790 = vmatpush3.bf16.msra.mxu1 %v2906_v12  ;;  %v2942_v12 = vld [vmem:[#allocation11 + $0x60] ss:$16 sps:$4 sm:$0xff]  }
  0x80   :  { %2791 = vmatprep.subr.bf16.mxu1 %v3326_v0  ;;  %2802 = vmatpush3.bf16.msra.mxu0 %v2910_v16  ;;  %v2948_v16 = vld [vmem:[#allocation11 + $0x40] ss:$16 sps:$4 sm:$0xff]  }
  0x81   :  { %2803 = vmatprep.subr.bf16.mxu0 %v3326_v0 }
  0x83   :  { %2792 = vmatpush3.bf16.msra.mxu1 %v2907_v13  ;;  %v2945_v13 = vld [vmem:[#allocation11 + $0x68] ss:$16 sps:$4 sm:$0xff]  }
  0x84   :  { %2793 = vmatprep.subr.bf16.mxu1 %v3326_v0  ;;  %2804 = vmatpush3.bf16.msra.mxu0 %v2911_v17  ;;  %v3328_v17 = vmov 0  }
  0x85   :  { %2805 = vmatprep.subr.bf16.mxu0 %v3326_v0 }
  0x87   :  { %2794 = vmatpush3.bf16.msra.mxu1 %v2908_v14  ;;  %v2950_v14 = vld [vmem:[#allocation11 + $0x44] ss:$16 sps:$4 sm:$0xff]  }
  0x88   :  { %2795 = vmatprep.subr.bf16.mxu1 %v3326_v0  ;;  %2806 = vmatpush3.bf16.msra.mxu0 %v2912_v18  ;;  %v2951_v18 = vld [vmem:[#allocation11 + $0x48] ss:$16 sps:$4 sm:$0xff]  }
  0x89   :  { %2807 = vmatprep.subr.bf16.mxu0 %v3326_v0 }
  0x8b   :  { %2796 = vmatpush3.bf16.msra.mxu1 %v2909_v15  ;;  %v2953_v15 = vld [vmem:[#allocation11 + $0x4c] ss:$16 sps:$4 sm:$0xff]  }
  0x8c   :  { %2808 = vmatpush3.bf16.msra.mxu0 %v2913_v19  ;;  %746 = vmatprep.subr.bf16.mxu1 %v2920_v50  ;;  %v2956_v19 = vld [vmem:[#allocation11 + $0x24] ss:$16 sps:$4 sm:$0xff]  }
  0x8d   :  { %2809 = vmatprep.subr.bf16.mxu0 %v3326_v0  ;;  %v2972_v50 = vld [vmem:[#allocation13 + $0x30] sm:$0xff]  }
  0x90   :  { %2810 = vmatpush3.bf16.msra.mxu0 %v2914_v20  ;;  %v2959_v20 = vld [vmem:[#allocation11 + $0x2c] ss:$16 sps:$4 sm:$0xff]  }
  0x91   :  { %2811 = vmatprep.subr.bf16.mxu0 %v3326_v0 }
  0x94   :  { %2812 = vmatpush3.bf16.msra.mxu0 %v2915_v21  ;;  %v2954_v21 = vld [vmem:[#allocation11 + $0x20] ss:$16 sps:$4 sm:$0xff]  }
  0x95   :  { %2813 = vmatprep.subr.bf16.mxu0 %v3326_v0 }
  0x98   :  { %2814 = vmatpush3.bf16.msra.mxu0 %v2916_v30 }
  0x99   :  { %2815 = vmatprep.subr.bf16.mxu0 %v3326_v0 }
  0x9c   :  { %2816 = vmatpush3.bf16.msra.mxu0 %v2917_v31 }
  0x9d   :  { %789 = vmatprep.subr.bf16.mxu0 %v2923_v52  ;;  %v2974_v52 = vld [vmem:[#allocation13 + $0x68] sm:$0xff]  }
 0x13e   :  { %v255_v22 = vpop.f32.mrf.mxu0 }
 0x13f   :  { %v256_v26 = vadd.f32 %v2437_v23, %v255_v22  ;;  %v2957_v22 = vld [vmem:[#allocation11 + $0x28] ss:$16 sps:$4 sm:$0xff]  }
 0x140   :  { %v2779_v24 = vpop.f32.mrf.mxu0 }
 0x141   :  { %v2965_v24 = vld [vmem:[#allocation11 + $0xc] ss:$16 sps:$4 sm:$0xff]  }
 0x142   :  { %v258_v25 = vpop.f32.mrf.mxu0 }
 0x143   :  { %v259_v27 = vadd.f32 %v2437_v23, %v258_v25  ;;  %v2962_v23 = vld [vmem:[#allocation11 + $0x4] ss:$16 sps:$4 sm:$0xff]   ;;  %v2960_v25 = vld [vmem:[#allocation11] ss:$16 sps:$4 sm:$0xff]  }
 0x144   :  { %v2780_v28 = vpop.f32.mrf.mxu0 }
 0x145   :  { %v264_v29 = vpack.c.bf16 %v259_v27, %v256_v26 }
 0x147   :  { %2798 = vmatmul.mubr.bf16.vlgmr.msra.gmra.mxu1 %v264_v29 }
 0x148   :  { %747 = vmatpush1.bf16.msra.mxu1 %v2918_v49  ;;  %778 = vmatprep.mubr.bf16.mxu1 %v3328_v17  ;;  %v2971_v49 = vld [vmem:[#allocation13 + $0xf0] sm:$0xff]  }
 0x149   :  { %748 = vmatprep.subr.bf16.mxu1 %v2926_v61  ;;  %v2983_v61 = vld [vmem:[#allocation13 + $0xd8] sm:$0xff]  }
 0x14c   :  { %749 = vmatpush1.bf16.msra.mxu1 %v2924_v63  ;;  %v2985_v63 = vld [vmem:[#allocation13 + $0x98] sm:$0xff]  }
 0x14d   :  { %750 = vmatprep.subr.bf16.mxu1 %v2932_v2  ;;  %v2987_v2 = vld [vmem:[#allocation13 + $0xd0] sm:$0xff]  }
 0x150   :  { %751 = vmatpush1.bf16.msra.mxu1 %v2930_v4  ;;  %v2989_v4 = vld [vmem:[#allocation13 + $0x90] sm:$0xff]  }
 0x151   :  { %752 = vmatprep.subr.bf16.mxu1 %v2938_v7  ;;  %v2992_v7 = vld [vmem:[#allocation13 + $0x8] sm:$0xff]  }
 0x154   :  { %753 = vmatpush1.bf16.msra.mxu1 %v2936_v6  ;;  %v2991_v6 = vld [vmem:[#allocation13 + $0xc8] sm:$0xff]  }
 0x155   :  { %754 = vmatprep.subr.bf16.mxu1 %v2944_v10  ;;  %v2995_v10 = vld [vmem:[#allocation13 + $0xc0] sm:$0xff]  }
 0x158   :  { %755 = vmatpush1.bf16.msra.mxu1 %v2942_v12  ;;  %v2997_v12 = vld [vmem:[#allocation13 + $0x80] sm:$0xff]  }
 0x159   :  { %756 = vmatprep.subr.bf16.mxu1 %v2950_v14 }
 0x15c   :  { %757 = vmatpush1.bf16.msra.mxu1 %v2948_v16 }
 0x15d   :  { %758 = vmatprep.subr.bf16.mxu1 %v2956_v19 }
 0x160   :  { %759 = vmatpush1.bf16.msra.mxu1 %v2954_v21 }
 0x161   :  { %760 = vmatprep.subr.bf16.mxu1 %v2962_v23 }
 0x164   :  { %761 = vmatpush1.bf16.msra.mxu1 %v2960_v25 }
 0x207   :  { %v370_v32 = vpop.f32.mrf.mxu1 }
 0x208   :  { %v371_v36 = vadd.f32 %v2443_v33, %v370_v32 }
 0x209   :  { %v2799_v34 = vpop.f32.mrf.mxu1 }
 0x20b   :  { %v373_v35 = vpop.f32.mrf.mxu1 }
 0x20c   :  { %v374_v37 = vadd.f32 %v2443_v33, %v373_v35  ;;  %v3514_v35 = vld [vmem:[%s3674_s7] ss:$0 sm:$0xff] }
 0x20d   :  { %v2800_v38 = vpop.f32.mrf.mxu1 }
 0x20e   :  { %v377_v39 = vpack.c.bf16 %v374_v37, %v371_v36 }
 0x210   :  { %2818 = vmatmul.mubr.bf16.vlgmr.msra.gmra.mxu0 %v377_v39  ;;  %v3521_v39 = vld [vmem:[%s3675_s8] ss:$0 sm:$0xff] }
 0x211   :  { %790 = vmatpush1.bf16.msra.mxu0 %v2921_v51  ;;  %821 = vmatprep.mubr.bf16.mxu0 %v3328_v17  ;;  %v2973_v51 = vld [vmem:[#allocation13 + $0xb0] sm:$0xff]  }
 0x212   :  { %791 = vmatprep.subr.bf16.mxu0 %v2929_v62  ;;  %v2984_v62 = vld [vmem:[#allocation13 + $0x18] sm:$0xff]  }
 0x215   :  { %792 = vmatpush1.bf16.msra.mxu0 %v2927_v1  ;;  %v2986_v1 = vld [vmem:[#allocation13 + $0x50] sm:$0xff]  }
 0x216   :  { %793 = vmatprep.subr.bf16.mxu0 %v2935_v3  ;;  %v2988_v3 = vld [vmem:[#allocation13 + $0x10] sm:$0xff]  }
 0x219   :  { %794 = vmatpush1.bf16.msra.mxu0 %v2933_v5  ;;  %v2990_v5 = vld [vmem:[#allocation13 + $0x48] sm:$0xff]  }
 0x21a   :  { %795 = vmatprep.subr.bf16.mxu0 %v2941_v9  ;;  %v2994_v9 = vld [vmem:[#allocation13 + $0x40] sm:$0xff]  }
 0x21d   :  { %796 = vmatpush1.bf16.msra.mxu0 %v2939_v8  ;;  %v2993_v8 = vld [vmem:[#allocation13 + $0x88] sm:$0xff]  }
 0x21e   :  { %797 = vmatprep.subr.bf16.mxu0 %v2947_v11  ;;  %v2996_v11 = vld [vmem:[#allocation13] sm:$0xff]  }
 0x221   :  { %798 = vmatpush1.bf16.msra.mxu0 %v2945_v13  ;;  %v566_v13 = vlaneseq }
 0x222   :  { %799 = vmatprep.subr.bf16.mxu0 %v2953_v15 }
 0x223   :  { %v3534_v14 = vshrl.u32 %v566_v13, 7 }
 0x225   :  { %800 = vmatpush1.bf16.msra.mxu0 %v2951_v18  ;;  %v568_v15 = vsub.s32 0, %v3534_v14  ;;  %v576_v16 = vsub.s32 2, %v3534_v14  ;;  %v564_v18 = vld [vmem:[%s3677_s10] sm:$0xf]  ;;  %v572_v19 = vsub.s32 1, %v3534_v14 }
 0x226   :  { %801 = vmatprep.subr.bf16.mxu0 %v2959_v20  ;;  %v580_v20 = vsub.s32 3, %v3534_v14 }
 0x227   :  { %v569_v23 = vrot.slane %v564_v18, %v568_v15  ;;  %v573_v25 = vrot.slane %v564_v18, %v572_v19 }
 0x229   :  { %802 = vmatpush1.bf16.msra.mxu0 %v2957_v22 }
 0x22a   :  { %803 = vmatprep.subr.bf16.mxu0 %v2965_v24  ;;  %v577_v24 = vrot.slane %v564_v18, %v576_v16 }
 0x2d0   :  { %v483_v41 = vpop.f32.mrf.mxu0 }
 0x2d1   :  { %v484_v42 = vadd.f32 %v2452_v40, %v483_v41 }
 0x2d2   :  { %v2819_v43 = vpop.f32.mrf.mxu0 }
 0x2d3   :  { %v490_v44 = vadd.f32 %v484_v42, %v256_v26  ;;  %v2963_v26 = vld [vmem:[#allocation11 + $0x8] ss:$16 sps:$4 sm:$0xff]  }
 0x2d4   :  { %v486_v45 = vpop.f32.mrf.mxu0  ;;  %804 = vmatpush1.bf16.msra.mxu0 %v2963_v26 }
 0x2d5   :  { %v487_v46 = vadd.f32 %v2452_v40, %v486_v45  ;;  %492 = vadd.xlane.f32.xlu0 %v490_v44  ;;  %v2967_v45 = vld [vmem:[#allocation13 + $0xf8] sm:$0xff]  }
 0x2d6   :  { %v2820_v47 = vpop.f32.mrf.mxu0  ;;  %2676 = vmatprep.subr.bf16.mxu0 %v2967_v45 }
 0x2d7   :  { %v491_v48 = vadd.f32 %v487_v46, %v259_v27  ;;  %v2968_v46 = vld [vmem:[#allocation13 + $0x38] sm:$0xff]  }
 0x2d8   :  { %v2969_v47 = vld [vmem:[#allocation13 + $0xb8] sm:$0xff]  }
 0x2d9   :  { %494 = vadd.xlane.f32.xlu0 %v491_v48 }
 0x35e   :  { %v493_v53 = vpop.xlane.xlu0 %492 }
 0x35f   :  { %v497_v54 = vmul.f32 0.0078125, %v493_v53  ;;  %v2975_v53 = vld [vmem:[#allocation13 + $0xe8] sm:$0xff]  }
 0x361   :  { %v3500_v55 = vsub.f32 %v490_v44, %v497_v54  ;;  %v2966_v44 = vld [vmem:[#allocation13 + $0x78] sm:$0xff]   ;;  %v2976_v54 = vld [vmem:[#allocation13 + $0x28] sm:$0xff]  }
 0x362   :  { %v495_v56 = vpop.xlane.xlu0 %494  ;;  %2654 = vmatprep.subr.bf16.mxu1 %v2966_v44 }
 0x363   :  { %v498_v57 = vmul.f32 0.0078125, %v495_v56  ;;  %v501_v58 = vmul.f32 %v3500_v55, %v3500_v55  ;;  %v2978_v56 = vld [vmem:[#allocation13 + $0x60] sm:$0xff]  }
 0x365   :  { %v3504_v59 = vsub.f32 %v491_v48, %v498_v57  ;;  %503 = vadd.xlane.f32.xlu1 %v501_v58  ;;  %v2970_v48 = vld [vmem:[#allocation13 + $0x70] sm:$0xff]   ;;  %v2979_v57 = vld [vmem:[#allocation13 + $0xe0] sm:$0xff]  }
 0x366   :  { %v2980_v58 = vld [vmem:[#allocation13 + $0x20] sm:$0xff]  }
 0x367   :  { %v502_v60 = vmul.f32 %v3504_v59, %v3504_v59 }
 0x369   :  { %505 = vadd.xlane.f32.xlu1 %v502_v60  ;;  %v2982_v60 = vld [vmem:[#allocation13 + $0x58] sm:$0xff]  }
 0x3ee   :  { %v504_v27 = vpop.xlane.xlu1 %503 }
 0x3ef   :  { %v507_v28 = vmul.f32 0.0078125, %v504_v27  ;;  %v581_v27 = vrot.slane %v564_v18, %v580_v20 }
 0x3f1   :  { %v509_v29 = vadd.f32 1e-05, %v507_v28 }
 0x3f2   :  { %v506_v30 = vpop.xlane.xlu1 %505 }
 0x3f3   :  { %3102 = vrsqrt.f32 %v509_v29  ;;  %v508_v31 = vmul.f32 0.0078125, %v506_v30 }
 0x3f5   :  { %v510_v32 = vadd.f32 1e-05, %v508_v31 }
 0x3f7   :  { %3104 = vrsqrt.f32 %v510_v32 }
 0x400   :  { %v3103_v33 = vpop.eup %3102 }
 0x401   :  { %v513_v34 = vmul.f32 %v3103_v33, %v3500_v55  ;;  %v2977_v55 = vld [vmem:[#allocation13 + $0xa8] sm:$0xff]  }
 0x403   :  { %v521_v38 = vmul.f32 %v3514_v35, %v513_v34 }
 0x404   :  { %v3105_v36 = vpop.eup %3104 }
 0x405   :  { %v514_v37 = vmul.f32 %v3105_v36, %v3504_v59  ;;  %v3525_v41 = vadd.f32 %v3521_v39, %v521_v38  ;;  %v2981_v59 = vld [vmem:[#allocation13 + $0xa0] sm:$0xff]  }
 0x407   :  { %v522_v40 = vmul.f32 %v3514_v35, %v514_v37 }
 0x409   :  { %v3528_v42 = vadd.f32 %v3521_v39, %v522_v40 }
 0x40b   :  { %v531_v43 = vpack.c.bf16 %v3528_v42, %v3525_v41 }
 0x40d   :  { %779 = vmatmul.mubr.bf16.vlgmr.msra.gmra.mxu1 %v531_v43  ;;  %822 = vmatmul.mubr.bf16.vlgmr.msra.gmra.mxu0 %v531_v43 }
 0x40e   :  { %2655 = vmatpush3.bf16.msra.mxu1 %v2968_v46  ;;  %2677 = vmatpush3.bf16.msra.mxu0 %v2969_v47 }
 0x40f   :  { %2656 = vmatprep.subr.bf16.mxu1 %v2970_v48  ;;  %2678 = vmatprep.subr.bf16.mxu0 %v2971_v49 }
 0x412   :  { %2657 = vmatpush3.bf16.msra.mxu1 %v2972_v50  ;;  %2679 = vmatpush3.bf16.msra.mxu0 %v2973_v51 }
 0x413   :  { %2658 = vmatprep.subr.bf16.mxu1 %v2974_v52  ;;  %2680 = vmatprep.subr.bf16.mxu0 %v2975_v53 }
 0x416   :  { %2659 = vmatpush3.bf16.msra.mxu1 %v2976_v54  ;;  %2681 = vmatpush3.bf16.msra.mxu0 %v2977_v55 }
 0x417   :  { %2660 = vmatprep.subr.bf16.mxu1 %v2978_v56  ;;  %2682 = vmatprep.subr.bf16.mxu0 %v2979_v57 }
 0x41a   :  { %2661 = vmatpush3.bf16.msra.mxu1 %v2980_v58  ;;  %2683 = vmatpush3.bf16.msra.mxu0 %v2981_v59 }
 0x41b   :  { %2662 = vmatprep.subr.bf16.mxu1 %v2982_v60  ;;  %2684 = vmatprep.subr.bf16.mxu0 %v2983_v61 }
 0x41e   :  { %2663 = vmatpush3.bf16.msra.mxu1 %v2984_v62  ;;  %2685 = vmatpush3.bf16.msra.mxu0 %v2985_v63 }
 0x41f   :  { %2664 = vmatprep.subr.bf16.mxu1 %v2986_v1  ;;  %2686 = vmatprep.subr.bf16.mxu0 %v2987_v2 }
 0x422   :  { %2665 = vmatpush3.bf16.msra.mxu1 %v2988_v3  ;;  %2687 = vmatpush3.bf16.msra.mxu0 %v2989_v4 }
 0x423   :  { %2666 = vmatprep.subr.bf16.mxu1 %v2990_v5  ;;  %2688 = vmatprep.subr.bf16.mxu0 %v2991_v6 }
 0x426   :  { %2667 = vmatpush3.bf16.msra.mxu1 %v2992_v7  ;;  %2689 = vmatpush3.bf16.msra.mxu0 %v2993_v8 }
 0x427   :  { %2668 = vmatprep.subr.bf16.mxu1 %v2994_v9  ;;  %2690 = vmatprep.subr.bf16.mxu0 %v2995_v10 }
 0x42a   :  { %2669 = vmatpush3.bf16.msra.mxu1 %v2996_v11  ;;  %2691 = vmatpush3.bf16.msra.mxu0 %v2997_v12 }
 0x42b   :  { %2821 = vmatprep.subr.bf16.mxu1 %v3326_v0  ;;  %2841 = vmatprep.subr.bf16.mxu0 %v3326_v0 }
 0x4cd   :  { %v780_v21 = vpop.f32.mrf.mxu1  ;;  %v823_v22 = vpop.f32.mrf.mxu0 }
 0x4ce   :  { %v781_v31 = vadd.f32 %v780_v21, %v569_v23  ;;  %v824_v32 = vadd.f32 %v823_v22, %v577_v24 }
 0x4cf   :  { %v782_v26 = vpop.f32.mrf.mxu1  ;;  %v825_v28 = vpop.f32.mrf.mxu0 }
 0x4d0   :  { %v783_v36 = vadd.f32 %v782_v26, %v573_v25  ;;  %v826_v37 = vadd.f32 %v825_v28, %v581_v27 }
 0x4d1   :  { %v784_v29 = vpop.f32.mrf.mxu1  ;;  %v827_v30 = vpop.f32.mrf.mxu0 }
 0x4d2   :  { %v785_v33 = vadd.f32 %v784_v29, %v569_v23  ;;  %v828_v34 = vadd.f32 %v827_v30, %v577_v24  ;;  %v2495_v30 = vld [vmem:[%s3679_s12] ss:$0 sm:$0xff] }
 0x4d3   :  { %v786_v38 = vpop.f32.mrf.mxu1  ;;  %v829_v40 = vpop.f32.mrf.mxu0 }
 0x4d4   :  { %v832_v43 = vpack.c.bf16 %v785_v33, %v781_v31  ;;  %v834_v44 = vpack.c.bf16 %v828_v34, %v824_v32  ;;  %v787_v45 = vadd.f32 %v786_v38, %v573_v25  ;;  %v830_v46 = vadd.f32 %v829_v40, %v581_v27 }
 0x4d6   :  { %v840_v47 = vmul.bf16 1027030327, %v832_v43  ;;  %v842_v48 = vmul.bf16 1027030327, %v834_v44  ;;  %v833_v49 = vpack.c.bf16 %v787_v45, %v783_v36  ;;  %v835_v50 = vpack.c.bf16 %v830_v46, %v826_v37 }
 0x4d7   :  { %v836_v22 = vmul.bf16 1056980736, %v832_v43  ;;  %v838_v24 = vmul.bf16 1056980736, %v834_v44 }
 0x4d8   :  { %v844_v51 = vmul.bf16 %v840_v47, %v832_v43  ;;  %v846_v52 = vmul.bf16 %v842_v48, %v834_v44  ;;  %v841_v53 = vmul.bf16 1027030327, %v833_v49  ;;  %v843_v54 = vmul.bf16 1027030327, %v835_v50 }
 0x4d9   :  { %v837_v11 = vmul.bf16 1056980736, %v833_v49  ;;  %v839_v18 = vmul.bf16 1056980736, %v835_v50 }
 0x4da   :  { %v848_v55 = vmul.bf16 %v844_v51, %v832_v43  ;;  %v850_v56 = vmul.bf16 %v846_v52, %v834_v44  ;;  %v845_v57 = vmul.bf16 %v841_v53, %v833_v49  ;;  %v847_v58 = vmul.bf16 %v843_v54, %v835_v50  ;;  %v2998_v51 = vld [vmem:[#allocation8 + $0x78] sm:$0xff]  }
 0x4dc   :  { %v849_v59 = vmul.bf16 %v845_v57, %v833_v49  ;;  %v851_v60 = vmul.bf16 %v847_v58, %v835_v50  ;;  %v852_v61 = vadd.bf16 %v848_v55, %v832_v43  ;;  %v854_v62 = vadd.bf16 %v850_v56, %v834_v44 }
 0x4de   :  { %v853_v63 = vadd.bf16 %v849_v59, %v833_v49  ;;  %v855_v1 = vadd.bf16 %v851_v60, %v835_v50  ;;  %v856_v2 = vmul.bf16 1061961548, %v852_v61  ;;  %v858_v3 = vmul.bf16 1061961548, %v854_v62  ;;  %v3001_v60 = vld [vmem:[#allocation8 + $0x60] sm:$0xff]   ;;  %v3002_v61 = vld [vmem:[#allocation8 + $0x58] sm:$0xff]  }
 0x4df   :  { %v3003_v62 = vld [vmem:[#allocation8 + $0x50] sm:$0xff]  }
 0x4e0   :  { %v857_v4 = vmul.bf16 1061961548, %v853_v63  ;;  %v859_v5 = vmul.bf16 1061961548, %v855_v1  ;;  %3106 = vtanh.bf16 %v856_v2  ;;  %v3004_v63 = vld [vmem:[#allocation8 + $0x48] sm:$0xff]   ;;  %v3005_v1 = vld [vmem:[#allocation8 + $0x40] sm:$0xff]  }
 0x4e1   :  { %3108 = vtanh.bf16 %v858_v3  ;;  %v3006_v2 = vld [vmem:[#allocation10 + $0x78] sm:$0xff]   ;;  %v3007_v3 = vld [vmem:[#allocation10 + $0x70] sm:$0xff]  }
 0x4e2   :  { %3110 = vtanh.bf16 %v857_v4  ;;  %v3008_v4 = vld [vmem:[#allocation10 + $0x68] sm:$0xff]  }
 0x4e3   :  { %3112 = vtanh.bf16 %v859_v5  ;;  %v3009_v5 = vld [vmem:[#allocation10 + $0x60] sm:$0xff]  }
 0x4ee   :  { %v3107_v6 = vpop.eup %3106 }
 0x4ef   :  { %v3109_v7 = vpop.eup %3108  ;;  %v864_v9 = vadd.bf16 1065369472, %v3107_v6  ;;  %v3010_v6 = vld [vmem:[#allocation10 + $0x58] sm:$0xff]  }
 0x4f0   :  { %v3111_v8 = vpop.eup %3110  ;;  %v866_v13 = vadd.bf16 1065369472, %v3109_v7  ;;  %v3011_v7 = vld [vmem:[#allocation10 + $0x50] sm:$0xff]  }
 0x4f1   :  { %v3113_v10 = vpop.eup %3112  ;;  %v865_v12 = vadd.bf16 1065369472, %v3111_v8  ;;  %v868_v26 = vmul.bf16 %v864_v9, %v836_v22 }
 0x4f2   :  { %v867_v21 = vadd.bf16 1065369472, %v3113_v10  ;;  %v870_v27 = vmul.bf16 %v866_v13, %v838_v24 }
 0x4f3   :  { %v869_v23 = vmul.bf16 %v865_v12, %v837_v11 }
 0x4f4   :  { %v871_v25 = vmul.bf16 %v867_v21, %v839_v18 }
 0x4f5   :  { %1167 = vmatprep.mubr.bf16.mxu1 %v869_v23 }
 0x4f6   :  { %1208 = vmatprep.mubr.bf16.mxu0 %v871_v25  ;;  %1168 = vmatmul.mubr.bf16.vlgmr.msra.gmra.mxu1 %v868_v26 }
 0x4f7   :  { %1209 = vmatmul.mubr.bf16.vlgmr.msra.gmra.mxu0 %v870_v27  ;;  %2837 = vmatprep.mubr.msk.bf16.mxu1 %vm3327_vm0, %v3326_v0 }
 0x4f8   :  { %2857 = vmatprep.mubr.msk.bf16.mxu0 %vm3327_vm0, %v3326_v0  ;;  %2822 = vmatpush3.bf16.msra.mxu1 %v2998_v51  ;;  %v3016_v51 = vld [vmem:[#allocation11 + $0x1e4] ss:$16 sps:$4 sm:$0xff]  }
 0x4f9   :  { %2823 = vmatprep.subr.bf16.mxu1 %v3326_v0  ;;  %2842 = vmatpush3.bf16.msra.mxu0 %v3006_v2  ;;  %v3026_v2 = vld [vmem:[#allocation11 + $0x1a0] ss:$16 sps:$4 sm:$0xff]  }
 0x4fa   :  { %2843 = vmatprep.subr.bf16.mxu0 %v3326_v0 }
 0x4fd   :  { %2844 = vmatpush3.bf16.msra.mxu0 %v3007_v3  ;;  %v3029_v3 = vld [vmem:[#allocation11 + $0x1a8] ss:$16 sps:$4 sm:$0xff]  }
 0x4fe   :  { %2845 = vmatprep.subr.bf16.mxu0 %v3326_v0 }
 0x501   :  { %2846 = vmatpush3.bf16.msra.mxu0 %v3008_v4  ;;  %v3032_v4 = vld [vmem:[#allocation11 + $0x180] ss:$16 sps:$4 sm:$0xff]  }
 0x502   :  { %2847 = vmatprep.subr.bf16.mxu0 %v3326_v0 }
 0x505   :  { %2848 = vmatpush3.bf16.msra.mxu0 %v3009_v5  ;;  %v3034_v5 = vld [vmem:[#allocation11 + $0x184] ss:$16 sps:$4 sm:$0xff]  }
 0x506   :  { %2849 = vmatprep.subr.bf16.mxu0 %v3326_v0 }
 0x509   :  { %2850 = vmatpush3.bf16.msra.mxu0 %v3010_v6  ;;  %v3035_v6 = vld [vmem:[#allocation11 + $0x188] ss:$16 sps:$4 sm:$0xff]  }
 0x50a   :  { %2851 = vmatprep.subr.bf16.mxu0 %v3326_v0 }
 0x50d   :  { %2852 = vmatpush3.bf16.msra.mxu0 %v3011_v7  ;;  %v3037_v7 = vld [vmem:[#allocation11 + $0x18c] ss:$16 sps:$4 sm:$0xff]  }
 0x50e   :  { %2853 = vmatprep.subr.bf16.mxu0 %v3326_v0 }
 0x5b6   :  { %v2670_v28 = vpop.f32.mrf.mxu1 }
 0x5b7   :  { %v2692_v29 = vpop.f32.mrf.mxu0 }
 0x5b8   :  { %v2671_v31 = vpop.f32.mrf.mxu1 }
 0x5b9   :  { %v2672_v32 = vadd.f32 %v2671_v31, %v2670_v28  ;;  %v2693_v33 = vpop.f32.mrf.mxu0 }
 0x5ba   :  { %v2673_v34 = vpop.f32.mrf.mxu1  ;;  %v2694_v37 = vadd.f32 %v2693_v33, %v2692_v29  ;;  %v3012_v29 = vld [vmem:[#allocation10 + $0x48] sm:$0xff]  }
 0x5bb   :  { %v1170_v36 = vadd.f32 %v2672_v32, %v2495_v30  ;;  %v2695_v38 = vpop.f32.mrf.mxu0  ;;  %2854 = vmatpush3.bf16.msra.mxu0 %v3012_v29  ;;  %v2531_v32 = vld [vmem:[%s3671_s4 + $0x1] ss:$0 sm:$0xff]  ;;  %v3059_v29 = vld [vmem:[#allocation11 + $0x108] ss:$16 sps:$4 sm:$0xff]  }
 0x5bc   :  { %v2674_v40 = vpop.f32.mrf.mxu1  ;;  %2855 = vmatprep.subr.bf16.mxu0 %v3326_v0 }
 0x5bd   :  { %v1211_v43 = vadd.f32 %v2694_v37, %v1170_v36  ;;  %v2675_v44 = vadd.f32 %v2674_v40, %v2673_v34  ;;  %v2696_v45 = vpop.f32.mrf.mxu0 }
 0x5be   :  { %v2697_v47 = vadd.f32 %v2696_v45, %v2695_v38  ;;  %v2541_v38 = vld [vmem:[%s3673_s6 + $0x1] ss:$0 sm:$0xff] }
 0x5bf   :  { %v1173_v46 = vadd.f32 %v2675_v44, %v2495_v30  ;;  %v1217_v48 = vadd.f32 %v1211_v43, %v3525_v41  ;;  %v2999_v41 = vld [vmem:[#allocation8 + $0x70] sm:$0xff]   ;;  %v3013_v30 = vld [vmem:[#allocation10 + $0x40] sm:$0xff]  }
 0x5c0   :  { %2824 = vmatpush3.bf16.msra.mxu1 %v2999_v41  ;;  %2856 = vmatpush3.bf16.msra.mxu0 %v3013_v30 }
 0x5c1   :  { %v1214_v49 = vadd.f32 %v2697_v47, %v1173_v46  ;;  %1219 = vadd.xlane.f32.xlu0 %v1217_v48  ;;  %2825 = vmatprep.subr.bf16.mxu1 %v3326_v0 }
 0x5c3   :  { %v1218_v50 = vadd.f32 %v1214_v49, %v3528_v42  ;;  %v3000_v42 = vld [vmem:[#allocation8 + $0x68] sm:$0xff]  }
 0x5c4   :  { %2826 = vmatpush3.bf16.msra.mxu1 %v3000_v42  ;;  %v3022_v42 = vld [vmem:[#allocation11 + $0x1c4] ss:$16 sps:$4 sm:$0xff]  }
 0x5c5   :  { %1221 = vadd.xlane.f32.xlu1 %v1218_v50  ;;  %2827 = vmatprep.subr.bf16.mxu1 %v3326_v0 }
 0x5c8   :  { %2828 = vmatpush3.bf16.msra.mxu1 %v3001_v60  ;;  %v3025_v60 = vld [vmem:[#allocation11 + $0x1cc] ss:$16 sps:$4 sm:$0xff]  }
 0x5c9   :  { %2829 = vmatprep.subr.bf16.mxu1 %v3326_v0 }
 0x5cc   :  { %2830 = vmatpush3.bf16.msra.mxu1 %v3002_v61  ;;  %v3020_v61 = vld [vmem:[#allocation11 + $0x1c0] ss:$16 sps:$4 sm:$0xff]  }
 0x5cd   :  { %2831 = vmatprep.subr.bf16.mxu1 %v3326_v0 }
 0x5d0   :  { %2832 = vmatpush3.bf16.msra.mxu1 %v3003_v62  ;;  %v3023_v62 = vld [vmem:[#allocation11 + $0x1c8] ss:$16 sps:$4 sm:$0xff]  }
 0x5d1   :  { %2833 = vmatprep.subr.bf16.mxu1 %v3326_v0 }
 0x5d4   :  { %2834 = vmatpush3.bf16.msra.mxu1 %v3004_v63  ;;  %v3028_v63 = vld [vmem:[#allocation11 + $0x1a4] ss:$16 sps:$4 sm:$0xff]  }
 0x5d5   :  { %2835 = vmatprep.subr.bf16.mxu1 %v3326_v0 }
 0x5d8   :  { %2836 = vmatpush3.bf16.msra.mxu1 %v3005_v1  ;;  %v3031_v1 = vld [vmem:[#allocation11 + $0x1ac] ss:$16 sps:$4 sm:$0xff]  }
 0x5d9   :  { %1736 = vmatprep.subr.bf16.mxu1 %v3016_v51  ;;  %v3064_v51 = vld [vmem:[#allocation13 + $0x138] sm:$0xff]  }
 0x64a   :  { %v1220_v52 = vpop.xlane.xlu0 %1219 }
 0x64b   :  { %v1223_v53 = vmul.f32 0.0078125, %v1220_v52  ;;  %v3017_v52 = vld [vmem:[#allocation11 + $0x1e8] ss:$16 sps:$4 sm:$0xff]  }
 0x64d   :  { %v1225_v54 = vsub.f32 %v1217_v48, %v1223_v53  ;;  %v3019_v53 = vld [vmem:[#allocation11 + $0x1ec] ss:$16 sps:$4 sm:$0xff]  }
 0x64e   :  { %v1222_v55 = vpop.xlane.xlu1 %1221  ;;  %1779 = vmatprep.subr.bf16.mxu0 %v3019_v53  ;;  %v3066_v53 = vld [vmem:[#allocation13 + $0x170] sm:$0xff]  }
 0x64f   :  { %v1224_v56 = vmul.f32 0.0078125, %v1222_v55  ;;  %v1227_v57 = vmul.f32 %v1225_v54, %v1225_v54 }
 0x651   :  { %v1226_v58 = vsub.f32 %v1218_v50, %v1224_v56  ;;  %1229 = vadd.xlane.f32.xlu0 %v1227_v57  ;;  %v3014_v50 = vld [vmem:[#allocation11 + $0x1e0] ss:$16 sps:$4 sm:$0xff]  }
 0x653   :  { %v1228_v59 = vmul.f32 %v1226_v58, %v1226_v58 }
 0x655   :  { %1231 = vadd.xlane.f32.xlu1 %v1228_v59 }
 0x6da   :  { %v1230_v8 = vpop.xlane.xlu0 %1229 }
 0x6db   :  { %v1233_v9 = vmul.f32 0.0078125, %v1230_v8  ;;  %v3040_v8 = vld [vmem:[#allocation11 + $0x164] ss:$16 sps:$4 sm:$0xff]  }
 0x6dd   :  { %v1235_v10 = vadd.f32 1e-05, %v1233_v9  ;;  %v3043_v9 = vld [vmem:[#allocation11 + $0x16c] ss:$16 sps:$4 sm:$0xff]  }
 0x6de   :  { %v1232_v11 = vpop.xlane.xlu1 %1231 }
 0x6df   :  { %3114 = vrsqrt.f32 %v1235_v10  ;;  %v1234_v12 = vmul.f32 0.0078125, %v1232_v11  ;;  %v3038_v10 = vld [vmem:[#allocation11 + $0x160] ss:$16 sps:$4 sm:$0xff]   ;;  %v3041_v11 = vld [vmem:[#allocation11 + $0x168] ss:$16 sps:$4 sm:$0xff]  }
 0x6e1   :  { %v1236_v13 = vadd.f32 1e-05, %v1234_v12  ;;  %v3046_v12 = vld [vmem:[#allocation11 + $0x144] ss:$16 sps:$4 sm:$0xff]  }
 0x6e3   :  { %3116 = vrsqrt.f32 %v1236_v13  ;;  %v3049_v13 = vld [vmem:[#allocation11 + $0x14c] ss:$16 sps:$4 sm:$0xff]  }
 0x6ec   :  { %v3115_v18 = vpop.eup %3114 }
 0x6ed   :  { %v1239_v21 = vmul.f32 %v3115_v18, %v1225_v54  ;;  %v3044_v18 = vld [vmem:[#allocation11 + $0x140] ss:$16 sps:$4 sm:$0xff]  }
 0x6ef   :  { %v1241_v24 = vmul.f32 %v3514_v35, %v1239_v21  ;;  %v3047_v21 = vld [vmem:[#allocation11 + $0x148] ss:$16 sps:$4 sm:$0xff]  }
 0x6f0   :  { %v3117_v22 = vpop.eup %3116 }
 0x6f1   :  { %v1240_v23 = vmul.f32 %v3117_v22, %v1226_v58  ;;  %v1243_v26 = vadd.f32 %v3521_v39, %v1241_v24  ;;  %v3052_v22 = vld [vmem:[#allocation11 + $0x124] ss:$16 sps:$4 sm:$0xff]   ;;  %v3050_v24 = vld [vmem:[#allocation11 + $0x120] ss:$16 sps:$4 sm:$0xff]  }
 0x6f3   :  { %v1242_v25 = vmul.f32 %v3514_v35, %v1240_v23  ;;  %v3055_v23 = vld [vmem:[#allocation11 + $0x12c] ss:$16 sps:$4 sm:$0xff]  }
 0x6f5   :  { %v1244_v27 = vadd.f32 %v3521_v39, %v1242_v25  ;;  %v3053_v25 = vld [vmem:[#allocation11 + $0x128] ss:$16 sps:$4 sm:$0xff]  }
 0x6f7   :  { %v1249_v28 = vpack.c.bf16 %v1244_v27, %v1243_v26 }
 0x6f9   :  { %2838 = vmatmul.mubr.bf16.vlgmr.msra.gmra.mxu1 %v1249_v28  ;;  %v3056_v28 = vld [vmem:[#allocation11 + $0x100] ss:$16 sps:$4 sm:$0xff]  }
 0x6fa   :  { %1768 = vmatprep.mubr.bf16.mxu1 %v3328_v17  ;;  %1737 = vmatpush1.bf16.msra.mxu1 %v3014_v50  ;;  %v3063_v50 = vld [vmem:[#allocation13 + $0x1f8] sm:$0xff]  }
 0x6fb   :  { %1738 = vmatprep.subr.bf16.mxu1 %v3022_v42  ;;  %v3075_v42 = vld [vmem:[#allocation13 + $0x1e0] sm:$0xff]  }
 0x6fe   :  { %1739 = vmatpush1.bf16.msra.mxu1 %v3020_v61  ;;  %v3077_v61 = vld [vmem:[#allocation13 + $0x1a0] sm:$0xff]  }
 0x6ff   :  { %1740 = vmatprep.subr.bf16.mxu1 %v3028_v63  ;;  %v3079_v63 = vld [vmem:[#allocation13 + $0x1d8] sm:$0xff]  }
 0x702   :  { %1741 = vmatpush1.bf16.msra.mxu1 %v3026_v2  ;;  %v3081_v2 = vld [vmem:[#allocation13 + $0x198] sm:$0xff]  }
 0x703   :  { %1742 = vmatprep.subr.bf16.mxu1 %v3034_v5  ;;  %v3084_v5 = vld [vmem:[#allocation13 + $0x110] sm:$0xff]  }
 0x706   :  { %1743 = vmatpush1.bf16.msra.mxu1 %v3032_v4  ;;  %v3083_v4 = vld [vmem:[#allocation13 + $0x1d0] sm:$0xff]  }
 0x707   :  { %1744 = vmatprep.subr.bf16.mxu1 %v3040_v8  ;;  %v3087_v8 = vld [vmem:[#allocation13 + $0x1c8] sm:$0xff]  }
 0x70a   :  { %1745 = vmatpush1.bf16.msra.mxu1 %v3038_v10  ;;  %v3089_v10 = vld [vmem:[#allocation13 + $0x188] sm:$0xff]  }
 0x70b   :  { %1746 = vmatprep.subr.bf16.mxu1 %v3046_v12  ;;  %v3091_v12 = vld [vmem:[#allocation13 + $0x1c0] sm:$0xff]  }
 0x70e   :  { %1747 = vmatpush1.bf16.msra.mxu1 %v3044_v18  ;;  %v3093_v18 = vld [vmem:[#allocation13 + $0x180] sm:$0xff]  }
 0x70f   :  { %1748 = vmatprep.subr.bf16.mxu1 %v3052_v22 }
 0x712   :  { %1749 = vmatpush1.bf16.msra.mxu1 %v3050_v24 }
 0x7b9   :  { %v1357_v31 = vpop.f32.mrf.mxu1 }
 0x7ba   :  { %v1358_v34 = vadd.f32 %v2531_v32, %v1357_v31 }
 0x7bb   :  { %v2839_v35 = vpop.f32.mrf.mxu1 }
 0x7bd   :  { %v1360_v33 = vpop.f32.mrf.mxu1 }
 0x7be   :  { %v1361_v36 = vadd.f32 %v2531_v32, %v1360_v33 }
 0x7bf   :  { %v2840_v39 = vpop.f32.mrf.mxu1 }
 0x7c0   :  { %v1364_v37 = vpack.c.bf16 %v1361_v36, %v1358_v34 }
 0x7c2   :  { %2858 = vmatmul.mubr.bf16.vlgmr.msra.gmra.mxu0 %v1364_v37  ;;  %v3598_v37 = vld [vmem:[%s3674_s7 + $0x1] ss:$0 sm:$0xff] }
 0x7c3   :  { %1811 = vmatprep.mubr.bf16.mxu0 %v3328_v17  ;;  %1780 = vmatpush1.bf16.msra.mxu0 %v3017_v52  ;;  %v3065_v52 = vld [vmem:[#allocation13 + $0x1b8] sm:$0xff]  }
 0x7c4   :  { %1781 = vmatprep.subr.bf16.mxu0 %v3025_v60  ;;  %v3076_v60 = vld [vmem:[#allocation13 + $0x120] sm:$0xff]  }
 0x7c7   :  { %1782 = vmatpush1.bf16.msra.mxu0 %v3023_v62  ;;  %v3078_v62 = vld [vmem:[#allocation13 + $0x158] sm:$0xff]  }
 0x7c8   :  { %1783 = vmatprep.subr.bf16.mxu0 %v3031_v1  ;;  %v3080_v1 = vld [vmem:[#allocation13 + $0x118] sm:$0xff]  }
 0x7cb   :  { %1784 = vmatpush1.bf16.msra.mxu0 %v3029_v3  ;;  %v3082_v3 = vld [vmem:[#allocation13 + $0x150] sm:$0xff]  }
 0x7cc   :  { %1785 = vmatprep.subr.bf16.mxu0 %v3037_v7  ;;  %v3086_v7 = vld [vmem:[#allocation13 + $0x148] sm:$0xff]  }
 0x7cf   :  { %1786 = vmatpush1.bf16.msra.mxu0 %v3035_v6  ;;  %v3085_v6 = vld [vmem:[#allocation13 + $0x190] sm:$0xff]  }
 0x7d0   :  { %1787 = vmatprep.subr.bf16.mxu0 %v3043_v9  ;;  %v3088_v9 = vld [vmem:[#allocation13 + $0x108] sm:$0xff]  }
 0x7d3   :  { %1788 = vmatpush1.bf16.msra.mxu0 %v3041_v11  ;;  %v3090_v11 = vld [vmem:[#allocation13 + $0x140] sm:$0xff]  }
 0x7d4   :  { %1789 = vmatprep.subr.bf16.mxu0 %v3049_v13  ;;  %v3092_v13 = vld [vmem:[#allocation13 + $0x100] sm:$0xff]  }
 0x7d7   :  { %1790 = vmatpush1.bf16.msra.mxu0 %v3047_v21  ;;  %v2552_v21 = vld [vmem:[%s3677_s10 + $0x4] sm:$0xf] }
 0x7d8   :  { %1791 = vmatprep.subr.bf16.mxu0 %v3055_v23  ;;  %v1559_v24 = vrot.slane %v2552_v21, %v568_v15 }
 0x7db   :  { %1792 = vmatpush1.bf16.msra.mxu0 %v3053_v25  ;;  %v1567_v25 = vrot.slane %v2552_v21, %v576_v16 }
 0x882   :  { %v1472_v40 = vpop.f32.mrf.mxu0 }
 0x883   :  { %v1473_v43 = vadd.f32 %v2541_v38, %v1472_v40 }
 0x884   :  { %v2859_v44 = vpop.f32.mrf.mxu0 }
 0x885   :  { %v1479_v45 = vadd.f32 %v1473_v43, %v1243_v26  ;;  %v3058_v26 = vld [vmem:[#allocation11 + $0x104] ss:$16 sps:$4 sm:$0xff]   ;;  %v3605_v44 = vld [vmem:[%s3675_s8 + $0x1] ss:$0 sm:$0xff] }
 0x886   :  { %v1475_v46 = vpop.f32.mrf.mxu0  ;;  %1750 = vmatprep.subr.bf16.mxu1 %v3058_v26  ;;  %v1563_v26 = vrot.slane %v2552_v21, %v572_v19 }
 0x887   :  { %v1476_v47 = vadd.f32 %v2541_v38, %v1475_v46  ;;  %1481 = vadd.xlane.f32.xlu0 %v1479_v45  ;;  %1751 = vmatpush1.bf16.msra.mxu1 %v3056_v28  ;;  %v1571_v28 = vrot.slane %v2552_v21, %v580_v20 }
 0x888   :  { %v2860_v48 = vpop.f32.mrf.mxu0 }
 0x889   :  { %v1480_v49 = vadd.f32 %v1476_v47, %v1244_v27  ;;  %v3061_v27 = vld [vmem:[#allocation11 + $0x10c] ss:$16 sps:$4 sm:$0xff]  }
 0x88a   :  { %1793 = vmatprep.subr.bf16.mxu0 %v3061_v27 }
 0x88b   :  { %1483 = vadd.xlane.f32.xlu1 %v1480_v49  ;;  %1794 = vmatpush1.bf16.msra.mxu0 %v3059_v29 }
 0x88c   :  { %2738 = vmatprep.subr.bf16.mxu0 %v3063_v50 }
 0x910   :  { %v1482_v17 = vpop.xlane.xlu0 %1481 }
 0x911   :  { %v1485_v54 = vmul.f32 0.0078125, %v1482_v17  ;;  %v3067_v17 = vld [vmem:[#allocation13 + $0x1f0] sm:$0xff]  }
 0x913   :  { %v3586_v55 = vsub.f32 %v1479_v45, %v1485_v54  ;;  %v3068_v54 = vld [vmem:[#allocation13 + $0x130] sm:$0xff]  }
 0x914   :  { %v1484_v56 = vpop.xlane.xlu1 %1483 }
 0x915   :  { %v1486_v57 = vmul.f32 0.0078125, %v1484_v56  ;;  %v1489_v58 = vmul.f32 %v3586_v55, %v3586_v55  ;;  %v3070_v56 = vld [vmem:[#allocation13 + $0x168] sm:$0xff]  }
 0x917   :  { %v3590_v59 = vsub.f32 %v1480_v49, %v1486_v57  ;;  %1491 = vadd.xlane.f32.xlu0 %v1489_v58  ;;  %v3062_v49 = vld [vmem:[#allocation13 + $0x178] sm:$0xff]   ;;  %v3071_v57 = vld [vmem:[#allocation13 + $0x1e8] sm:$0xff]  }
 0x918   :  { %2716 = vmatprep.subr.bf16.mxu1 %v3062_v49  ;;  %v3072_v58 = vld [vmem:[#allocation13 + $0x128] sm:$0xff]  }
 0x919   :  { %v1490_v41 = vmul.f32 %v3590_v59, %v3590_v59 }
 0x91b   :  { %1493 = vadd.xlane.f32.xlu1 %v1490_v41  ;;  %v3074_v41 = vld [vmem:[#allocation13 + $0x160] sm:$0xff]  }
 0x9a0   :  { %v1492_v30 = vpop.xlane.xlu0 %1491 }
 0x9a1   :  { %v1495_v31 = vmul.f32 0.0078125, %v1492_v30 }
 0x9a3   :  { %v1497_v32 = vadd.f32 1e-05, %v1495_v31 }
 0x9a4   :  { %v1494_v35 = vpop.xlane.xlu1 %1493 }
 0x9a5   :  { %3118 = vrsqrt.f32 %v1497_v32  ;;  %v1496_v33 = vmul.f32 0.0078125, %v1494_v35 }
 0x9a7   :  { %v1498_v34 = vadd.f32 1e-05, %v1496_v33 }
 0x9a9   :  { %3120 = vrsqrt.f32 %v1498_v34 }
 0x9b2   :  { %v3119_v36 = vpop.eup %3118 }
 0x9b3   :  { %v1501_v39 = vmul.f32 %v3119_v36, %v3586_v55  ;;  %v3069_v55 = vld [vmem:[#allocation13 + $0x1b0] sm:$0xff]  }
 0x9b5   :  { %v1509_v43 = vmul.f32 %v3598_v37, %v1501_v39 }
 0x9b6   :  { %v3121_v38 = vpop.eup %3120 }
 0x9b7   :  { %v1502_v40 = vmul.f32 %v3121_v38, %v3590_v59  ;;  %v3609_v46 = vadd.f32 %v3605_v44, %v1509_v43  ;;  %v3073_v59 = vld [vmem:[#allocation13 + $0x1a8] sm:$0xff]  }
 0x9b9   :  { %v1510_v45 = vmul.f32 %v3598_v37, %v1502_v40 }
 0x9bb   :  { %v3612_v47 = vadd.f32 %v3605_v44, %v1510_v45 }
 0x9bd   :  { %v1519_v48 = vpack.c.bf16 %v3612_v47, %v3609_v46 }
 0x9bf   :  { %1769 = vmatmul.mubr.bf16.vlgmr.msra.gmra.mxu1 %v1519_v48  ;;  %1812 = vmatmul.mubr.bf16.vlgmr.msra.gmra.mxu0 %v1519_v48 }
 0x9c0   :  { %2717 = vmatpush3.bf16.msra.mxu1 %v3064_v51  ;;  %2739 = vmatpush3.bf16.msra.mxu0 %v3065_v52 }
 0x9c1   :  { %2718 = vmatprep.subr.bf16.mxu1 %v3066_v53  ;;  %2740 = vmatprep.subr.bf16.mxu0 %v3067_v17 }
 0x9c4   :  { %2719 = vmatpush3.bf16.msra.mxu1 %v3068_v54  ;;  %2741 = vmatpush3.bf16.msra.mxu0 %v3069_v55 }
 0x9c5   :  { %2720 = vmatprep.subr.bf16.mxu1 %v3070_v56  ;;  %2742 = vmatprep.subr.bf16.mxu0 %v3071_v57 }
 0x9c8   :  { %2721 = vmatpush3.bf16.msra.mxu1 %v3072_v58  ;;  %2743 = vmatpush3.bf16.msra.mxu0 %v3073_v59 }
 0x9c9   :  { %2722 = vmatprep.subr.bf16.mxu1 %v3074_v41  ;;  %2744 = vmatprep.subr.bf16.mxu0 %v3075_v42 }
 0x9cc   :  { %2723 = vmatpush3.bf16.msra.mxu1 %v3076_v60  ;;  %2745 = vmatpush3.bf16.msra.mxu0 %v3077_v61 }
 0x9cd   :  { %2724 = vmatprep.subr.bf16.mxu1 %v3078_v62  ;;  %2746 = vmatprep.subr.bf16.mxu0 %v3079_v63 }
 0x9d0   :  { %2725 = vmatpush3.bf16.msra.mxu1 %v3080_v1  ;;  %2747 = vmatpush3.bf16.msra.mxu0 %v3081_v2 }
 0x9d1   :  { %2726 = vmatprep.subr.bf16.mxu1 %v3082_v3  ;;  %2748 = vmatprep.subr.bf16.mxu0 %v3083_v4 }
 0x9d4   :  { %2727 = vmatpush3.bf16.msra.mxu1 %v3084_v5  ;;  %2749 = vmatpush3.bf16.msra.mxu0 %v3085_v6 }
 0x9d5   :  { %2728 = vmatprep.subr.bf16.mxu1 %v3086_v7  ;;  %2750 = vmatprep.subr.bf16.mxu0 %v3087_v8 }
 0x9d8   :  { %2729 = vmatpush3.bf16.msra.mxu1 %v3088_v9  ;;  %2751 = vmatpush3.bf16.msra.mxu0 %v3089_v10 }
 0x9d9   :  { %2730 = vmatprep.subr.bf16.mxu1 %v3090_v11  ;;  %2752 = vmatprep.subr.bf16.mxu0 %v3091_v12 }
 0x9dc   :  { %2731 = vmatpush3.bf16.msra.mxu1 %v3092_v13  ;;  %2753 = vmatpush3.bf16.msra.mxu0 %v3093_v18 }
 0x9dd   :  { %2861 = vmatprep.subr.bf16.mxu1 %v3326_v0 }
 0xa7f   :  { %v1770_v22 = vpop.f32.mrf.mxu1  ;;  %v1813_v23 = vpop.f32.mrf.mxu0 }
 0xa80   :  { %v1771_v32 = vadd.f32 %v1770_v22, %v1559_v24  ;;  %v1814_v35 = vadd.f32 %v1813_v23, %v1567_v25 }
 0xa81   :  { %v1772_v27 = vpop.f32.mrf.mxu1  ;;  %v1815_v29 = vpop.f32.mrf.mxu0 }
 0xa82   :  { %v1773_v36 = vadd.f32 %v1772_v27, %v1563_v26  ;;  %v1816_v39 = vadd.f32 %v1815_v29, %v1571_v28 }
 0xa83   :  { %v1774_v30 = vpop.f32.mrf.mxu1  ;;  %v1817_v31 = vpop.f32.mrf.mxu0 }
 0xa84   :  { %v1775_v33 = vadd.f32 %v1774_v30, %v1559_v24  ;;  %v1818_v34 = vadd.f32 %v1817_v31, %v1567_v25  ;;  %v2586_v25 = vld [vmem:[%s3679_s12 + $0x1] ss:$0 sm:$0xff] }
 0xa85   :  { %v1776_v15 = vpop.f32.mrf.mxu1  ;;  %v1819_v38 = vpop.f32.mrf.mxu0 }
 0xa86   :  { %v1822_v40 = vpack.c.bf16 %v1775_v33, %v1771_v32  ;;  %v1824_v16 = vpack.c.bf16 %v1818_v34, %v1814_v35  ;;  %v1777_v43 = vadd.f32 %v1776_v15, %v1563_v26  ;;  %v1820_v45 = vadd.f32 %v1819_v38, %v1571_v28 }
 0xa88   :  { %v1830_v19 = vmul.bf16 1027030327, %v1822_v40  ;;  %v1832_v48 = vmul.bf16 1027030327, %v1824_v16  ;;  %v1823_v49 = vpack.c.bf16 %v1777_v43, %v1773_v36  ;;  %v1825_v14 = vpack.c.bf16 %v1820_v45, %v1816_v39 }
 0xa89   :  { %v1826_v11 = vmul.bf16 1056980736, %v1822_v40  ;;  %v1828_v13 = vmul.bf16 1056980736, %v1824_v16 }
 0xa8a   :  { %v1834_v20 = vmul.bf16 %v1830_v19, %v1822_v40  ;;  %v1836_v50 = vmul.bf16 %v1832_v48, %v1824_v16  ;;  %v1831_v51 = vmul.bf16 1027030327, %v1823_v49  ;;  %v1833_v52 = vmul.bf16 1027030327, %v1825_v14 }
 0xa8b   :  { %v1827_v6 = vmul.bf16 1056980736, %v1823_v49  ;;  %v1829_v9 = vmul.bf16 1056980736, %v1825_v14 }
 0xa8c   :  { %v1838_v53 = vmul.bf16 %v1834_v20, %v1822_v40  ;;  %v1840_v17 = vmul.bf16 %v1836_v50, %v1824_v16  ;;  %v1835_v54 = vmul.bf16 %v1831_v51, %v1823_v49  ;;  %v1837_v55 = vmul.bf16 %v1833_v52, %v1825_v14 }
 0xa8e   :  { %v1839_v56 = vmul.bf16 %v1835_v54, %v1823_v49  ;;  %v1841_v57 = vmul.bf16 %v1837_v55, %v1825_v14  ;;  %v1842_v58 = vadd.bf16 %v1838_v53, %v1822_v40  ;;  %v1844_v59 = vadd.bf16 %v1840_v17, %v1824_v16 }
 0xa90   :  { %v1843_v41 = vadd.bf16 %v1839_v56, %v1823_v49  ;;  %v1845_v42 = vadd.bf16 %v1841_v57, %v1825_v14  ;;  %v1846_v60 = vmul.bf16 1061961548, %v1842_v58  ;;  %v1848_v61 = vmul.bf16 1061961548, %v1844_v59 }
 0xa92   :  { %v1847_v62 = vmul.bf16 1061961548, %v1843_v41  ;;  %v1849_v63 = vmul.bf16 1061961548, %v1845_v42  ;;  %3122 = vtanh.bf16 %v1846_v60  ;;  %v3094_v60 = vld [vmem:[#allocation14 + $0x38] sm:$0xff]  }
 0xa93   :  { %3124 = vtanh.bf16 %v1848_v61 }
 0xa94   :  { %3126 = vtanh.bf16 %v1847_v62 }
 0xa95   :  { %3128 = vtanh.bf16 %v1849_v63 }
 0xaa0   :  { %v3123_v1 = vpop.eup %3122 }
 0xaa1   :  { %v3125_v2 = vpop.eup %3124  ;;  %v1854_v4 = vadd.bf16 1065369472, %v3123_v1 }
 0xaa2   :  { %v3127_v3 = vpop.eup %3126  ;;  %v1856_v8 = vadd.bf16 1065369472, %v3125_v2 }
 0xaa3   :  { %v3129_v5 = vpop.eup %3128  ;;  %v1855_v7 = vadd.bf16 1065369472, %v3127_v3  ;;  %v1858_v21 = vmul.bf16 %v1854_v4, %v1826_v11 }
 0xaa4   :  { %v1857_v10 = vadd.bf16 1065369472, %v3129_v5  ;;  %v1860_v22 = vmul.bf16 %v1856_v8, %v1828_v13  ;;  %v3099_v8 = vld [vmem:[#allocation14 + $0x10] sm:$0xff]  }
 0xaa5   :  { %v1859_v12 = vmul.bf16 %v1855_v7, %v1827_v6  ;;  %v3095_v6 = vld [vmem:[#allocation14 + $0x30] sm:$0xff]   ;;  %v3098_v7 = vld [vmem:[#allocation14 + $0x18] sm:$0xff]  }
 0xaa6   :  { %v1861_v18 = vmul.bf16 %v1857_v10, %v1829_v9  ;;  %v3100_v9 = vld [vmem:[#allocation14 + $0x8] sm:$0xff]   ;;  %v3101_v10 = vld [vmem:[#allocation14] sm:$0xff]  }
 0xaa7   :  { %2159 = vmatprep.mubr.bf16.mxu1 %v1859_v12 }
 0xaa8   :  { %2200 = vmatprep.mubr.bf16.mxu0 %v1861_v18  ;;  %2160 = vmatmul.mubr.bf16.vlgmr.msra.gmra.mxu1 %v1858_v21 }
 0xaa9   :  { %2201 = vmatmul.mubr.bf16.vlgmr.msra.gmra.mxu0 %v1860_v22  ;;  %2877 = vmatprep.mubr.msk.bf16.mxu1 %vm3327_vm0, %v3326_v0 }
 0xaaa   :  { %2862 = vmatpush3.bf16.msra.mxu1 %v3094_v60 }
 0xaab   :  { %2863 = vmatprep.subr.bf16.mxu1 %v3326_v0 }
 0xaae   :  { %2864 = vmatpush3.bf16.msra.mxu1 %v3095_v6 }
 0xaaf   :  { %2865 = vmatprep.subr.bf16.mxu1 %v3326_v0 }
 0xb68   :  { %v2732_v23 = vpop.f32.mrf.mxu1 }
 0xb69   :  { %v2754_v24 = vpop.f32.mrf.mxu0 }
 0xb6a   :  { %v2733_v26 = vpop.f32.mrf.mxu1 }
 0xb6b   :  { %v2734_v27 = vadd.f32 %v2733_v26, %v2732_v23  ;;  %v2755_v28 = vpop.f32.mrf.mxu0 }
 0xb6c   :  { %v2735_v29 = vpop.f32.mrf.mxu1  ;;  %v2756_v31 = vadd.f32 %v2755_v28, %v2754_v24 }
 0xb6d   :  { %v2162_v30 = vadd.f32 %v2734_v27, %v2586_v25  ;;  %v2757_v32 = vpop.f32.mrf.mxu0 }
 0xb6e   :  { %v2736_v35 = vpop.f32.mrf.mxu1 }
 0xb6f   :  { %v2203_v33 = vadd.f32 %v2756_v31, %v2162_v30  ;;  %v2737_v34 = vadd.f32 %v2736_v35, %v2735_v29  ;;  %v2758_v36 = vpop.f32.mrf.mxu0  ;;  %v2621_v35 = vld [vmem:[%s3683_s16] ss:$0 sm:$0xff] }
 0xb70   :  { %v2759_v15 = vadd.f32 %v2758_v36, %v2757_v32 }
 0xb71   :  { %v2165_v39 = vadd.f32 %v2737_v34, %v2586_v25  ;;  %v2209_v38 = vadd.f32 %v2203_v33, %v3609_v46  ;;  %v2619_v25 = vld [vmem:[%s3680_s13] ss:$0 sm:$0xff] }
 0xb73   :  { %v2206_v40 = vadd.f32 %v2759_v15, %v2165_v39  ;;  %2211 = vadd.xlane.f32.xlu0 %v2209_v38 }
 0xb75   :  { %v2210_v16 = vadd.f32 %v2206_v40, %v3612_v47 }
 0xb77   :  { %2213 = vadd.xlane.f32.xlu1 %v2210_v16 }
 0xbfc   :  { %v2212_v43 = vpop.xlane.xlu0 %2211 }
 0xbfd   :  { %v2215_v45 = vmul.f32 0.0078125, %v2212_v43 }
 0xbff   :  { %v2217_v19 = vsub.f32 %v2209_v38, %v2215_v45 }
 0xc00   :  { %v2214_v48 = vpop.xlane.xlu1 %2213 }
 0xc01   :  { %v2216_v49 = vmul.f32 0.0078125, %v2214_v48  ;;  %v2219_v14 = vmul.f32 %v2217_v19, %v2217_v19 }
 0xc03   :  { %v2218_v20 = vsub.f32 %v2210_v16, %v2216_v49  ;;  %2221 = vadd.xlane.f32.xlu0 %v2219_v14 }
 0xc05   :  { %v2220_v50 = vmul.f32 %v2218_v20, %v2218_v20 }
 0xc07   :  { %2223 = vadd.xlane.f32.xlu1 %v2220_v50 }
 0xc8c   :  { %v2222_v51 = vpop.xlane.xlu0 %2221 }
 0xc8d   :  { %v2225_v52 = vmul.f32 0.0078125, %v2222_v51 }
 0xc8f   :  { %v2227_v53 = vadd.f32 1e-05, %v2225_v52 }
 0xc90   :  { %v2224_v17 = vpop.xlane.xlu1 %2223 }
 0xc91   :  { %3130 = vrsqrt.f32 %v2227_v53  ;;  %v2226_v46 = vmul.f32 0.0078125, %v2224_v17  ;;  %v2630_v17 = vld [vmem:[%s3684_s17] ss:$0 sm:$0xff] }
 0xc93   :  { %v2228_v54 = vadd.f32 1e-05, %v2226_v46 }
 0xc95   :  { %3132 = vrsqrt.f32 %v2228_v54 }
 0xc9e   :  { %v3131_v47 = vpop.eup %3130 }
 0xc9f   :  { %v2231_v55 = vmul.f32 %v3131_v47, %v2217_v19 }
 0xca1   :  { %v2233_v56 = vmul.f32 %v3598_v37, %v2231_v55 }
 0xca2   :  { %v3133_v57 = vpop.eup %3132 }
 0xca3   :  { %v2235_v58 = vadd.f32 %v3605_v44, %v2233_v56  ;;  %v2232_v59 = vmul.f32 %v3133_v57, %v2218_v20 }
 0xca5   :  { %2239 = vadd.xlane.f32.xlu0 %v2235_v58  ;;  %v2234_v41 = vmul.f32 %v3598_v37, %v2232_v59  ;;  %v3096_v37 = vld [vmem:[#allocation14 + $0x28] sm:$0xff]   ;;  %v2422_v59 = vstv %s3685_s18 }
 0xca6   :  { %2866 = vmatpush3.bf16.msra.mxu1 %v3096_v37 }
 0xca7   :  { %v2236_v42 = vadd.f32 %v3605_v44, %v2234_v41  ;;  %v3097_v44 = vld [vmem:[#allocation14 + $0x20] sm:$0xff]   ;;  %2867 = vmatprep.subr.bf16.mxu1 %v3326_v0 }
 0xca9   :  { %2241 = vadd.xlane.f32.xlu1 %v2236_v42 }
 0xcaa   :  { %2868 = vmatpush3.bf16.msra.mxu1 %v3097_v44 }
 0xcab   :  { %2869 = vmatprep.subr.bf16.mxu1 %v3326_v0 }
 0xcae   :  { %2870 = vmatpush3.bf16.msra.mxu1 %v3098_v7 }
 0xcaf   :  { %2871 = vmatprep.subr.bf16.mxu1 %v3326_v0 }
 0xcb2   :  { %2872 = vmatpush3.bf16.msra.mxu1 %v3099_v8 }
 0xcb3   :  { %2873 = vmatprep.subr.bf16.mxu1 %v3326_v0 }
 0xcb6   :  { %2874 = vmatpush3.bf16.msra.mxu1 %v3100_v9 }
 0xcb7   :  { %2875 = vmatprep.subr.bf16.mxu1 %v3326_v0  ;;  %v2620_v0 = vld [vmem:[%s3681_s14] ss:$0 sm:$0xff] }
 0xcba   :  { %2876 = vmatpush3.bf16.msra.mxu1 %v3101_v10 }
 0xd2e   :  { %v2240_v61 = vpop.xlane.xlu0 %2239 }
 0xd2f   :  { %v2243_v62 = vmul.f32 0.0078125, %v2240_v61 }
 0xd31   :  { %v2245_v63 = vsub.f32 %v2235_v58, %v2243_v62 }
 0xd32   :  { %v2242_v1 = vpop.xlane.xlu1 %2241 }
 0xd33   :  { %v2244_v2 = vmul.f32 0.0078125, %v2242_v1  ;;  %v2247_v3 = vmul.f32 %v2245_v63, %v2245_v63 }
 0xd35   :  { %v2246_v4 = vsub.f32 %v2236_v42, %v2244_v2  ;;  %2249 = vadd.xlane.f32.xlu0 %v2247_v3 }
 0xd37   :  { %v2248_v5 = vmul.f32 %v2246_v4, %v2246_v4 }
 0xd39   :  { %2251 = vadd.xlane.f32.xlu1 %v2248_v5 }
 0xdbe   :  { %v2250_v11 = vpop.xlane.xlu0 %2249 }
 0xdbf   :  { %v2253_v12 = vmul.f32 0.0078125, %v2250_v11 }
 0xdc1   :  { %v2255_v13 = vadd.f32 1e-05, %v2253_v12 }
 0xdc2   :  { %v2252_v18 = vpop.xlane.xlu1 %2251 }
 0xdc3   :  { %3134 = vrsqrt.f32 %v2255_v13  ;;  %v2254_v21 = vmul.f32 0.0078125, %v2252_v18 }
 0xdc5   :  { %v2256_v22 = vadd.f32 1e-05, %v2254_v21 }
 0xdc7   :  { %3136 = vrsqrt.f32 %v2256_v22 }
 0xdd0   :  { %v3135_v23 = vpop.eup %3134 }
 0xdd1   :  { %v2259_v24 = vmul.f32 %v3135_v23, %v2245_v63 }
 0xdd3   :  { %v2267_v28 = vmul.f32 %v2619_v25, %v2259_v24 }
 0xdd4   :  { %v3137_v26 = vpop.eup %3136 }
 0xdd5   :  { %v2260_v27 = vmul.f32 %v3137_v26, %v2246_v4  ;;  %v2275_v30 = vadd.f32 %v2620_v0, %v2267_v28 }
 0xdd7   :  { %v2268_v29 = vmul.f32 %v2619_v25, %v2260_v27 }
 0xdd9   :  { %v2276_v31 = vadd.f32 %v2620_v0, %v2268_v29 }
 0xddb   :  { %v2277_v32 = vpack.c.bf16 %v2276_v31, %v2275_v30 }
 0xddd   :  { %2878 = vmatmul.mubr.bf16.vlgmr.msra.gmra.mxu1 %v2277_v32 }
 0xe9d   :  { %v2383_v33 = vpop.f32.mrf.mxu1 }
 0xe9e   :  { %v2384_v34 = vadd.f32 %v2621_v35, %v2383_v33 }
 0xe9f   :  { %v2879_v36 = vpop.f32.mrf.mxu1 }
 0xea0   :  { %v2392_v39 = vmul.f32 0.044715, %v2384_v34  ;;  %v2390_v52 = vmul.f32 0.5, %v2384_v34 }
 0xea1   :  { %v2386_v15 = vpop.f32.mrf.mxu1 }
 0xea2   :  { %v2394_v38 = vmul.f32 %v2392_v39, %v2384_v34  ;;  %v2387_v40 = vadd.f32 %v2621_v35, %v2386_v15 }
 0xea3   :  { %v2880_v16 = vpop.f32.mrf.mxu1 }
 0xea4   :  { %v2393_v43 = vmul.f32 0.044715, %v2387_v40  ;;  %v2396_v45 = vmul.f32 %v2394_v38, %v2384_v34  ;;  %v2391_v55 = vmul.f32 0.5, %v2387_v40 }
 0xea6   :  { %v2395_v19 = vmul.f32 %v2393_v43, %v2387_v40  ;;  %v2398_v48 = vadd.f32 %v2396_v45, %v2384_v34 }
 0xea8   :  { %v2400_v49 = vmul.f32 0.7978846, %v2398_v48  ;;  %v2397_v14 = vmul.f32 %v2395_v19, %v2387_v40 }
 0xeaa   :  { %3138 = vtanh.f32 %v2400_v49  ;;  %v2399_v20 = vadd.f32 %v2397_v14, %v2387_v40 }
 0xeac   :  { %v2401_v50 = vmul.f32 0.7978846, %v2399_v20 }
 0xeae   :  { %3140 = vtanh.f32 %v2401_v50 }
 0xeb7   :  { %v3139_v51 = vpop.eup %3138 }
 0xeb8   :  { %v2404_v53 = vadd.f32 1.0, %v3139_v51 }
 0xeba   :  { %v2406_v46 = vmul.f32 %v2404_v53, %v2390_v52 }
 0xebb   :  { %v3141_v54 = vpop.eup %3140 }
 0xebc   :  { %v2415_v47 = vmul.f32 %v2630_v17, %v2406_v46  ;;  %v2405_v56 = vadd.f32 1.0, %v3141_v54 }
 0xebe   :  { %2417 = vadd.xlane.f32.xlu0 %v2415_v47  ;;  %v2407_v57 = vmul.f32 %v2405_v56, %v2391_v55 }
 0xec0   :  { %v2416_v58 = vmul.f32 %v2630_v17, %v2407_v57 }
 0xec2   :  { %2419 = vadd.xlane.f32.xlu1 %v2416_v58 }
 0xf47   :  { %v2418_v41 = vpop.xlane.xlu0 %2417 }
 0xf48   :  { %v2423_v42 = vadd.f32 %v2422_v59, %v2418_v41 }
 0xf4a   :  { %2426 = vst.msk [vmem:[%s3686_s19] sm:$0xff] %vm2425_vm2, %v2423_v42 }
 0xf4b   :  { %v2420_v60 = vpop.xlane.xlu1 %2419 }
 0xf4c   :  { %v2424_v61 = vadd.f32 %v2422_v59, %v2420_v60 }
 0xf4e   :  { %2427 = vst.msk [vmem:[%s3686_s19 + $0x8] sm:$0xff] %vm2425_vm2, %v2424_v61 }
 0xf4f   :  { %2432 = vsyncpa [#allocation4], 1 }
 0xf50   :  { %2433 = vsyncpa [#allocation6], 1 }
 0xf51   :  { %2434 = vsyncpa [#allocation9], 1 }
 0xf52   :  { %2435 = vsyncpa [#allocation12], 1 }
 0xf53   :  { %2436 = vsyncpa [#allocation15], 1 }

</bundles_post_ra>
